<compile_context>
chip_gen: v6e
topology: v6e:2x2x1
jax: 0.10.0
libtpu: 0.0.40
codegen_flags: <defaults>
</compile_context>

<pallas_src>
import functools

import numpy as np
import jax
import jax.numpy as jnp
from jax.experimental import pallas as pl
from jax.experimental.pallas import tpu as pltpu


# ----------------------------------------------------------------------------
# Pallas kernel: fused RPN head for one (batch, row-tile) grid cell
# ----------------------------------------------------------------------------
def _rpn_kernel(xp_ref, w1_ref, b1_ref, wh_ref, bh_ref, out_ref, acc_ref,
                *, row_tile, w_pad, n_anchor):
    # xp_ref : (1, H+2, w_pad+2, C)  padded NHWC feature map (f32, resident per batch)
    # w1_ref : (9, C, M)  bf16 conv1 taps, index k = ky*3 + kx
    # b1_ref : (1, M) f32,  wh_ref: (M, OW) bf16 fused heads,  bh_ref: (1, OW) f32
    # out_ref: (1, row_tile*w_pad, OW) f32 lane-dense packed output
    t = pl.program_id(1)
    th = row_tile
    tw = th * w_pad
    c_in = xp_ref.shape[3]
    y0 = pl.multiple_of(t * th, th)

    # 3x3 conv (pad 1, stride 1) as 9 shifted-window MXU matmuls, f32 accumulation.
    for dy in range(3):
        slab = xp_ref[0, pl.ds(y0 + dy, th), :, :]            # (th, w_pad+2, C) f32
        for dx in range(3):
            win = slab[:, dx:dx + w_pad, :]                    # (th, w_pad, C)
            lhs = win.reshape(tw, c_in).astype(jnp.bfloat16)   # lane dim (C) preserved
            contrib = jnp.dot(lhs, w1_ref[dy * 3 + dx],
                              preferred_element_type=jnp.float32)
            if dy == 0 and dx == 0:
                acc_ref[...] = contrib
            else:
                acc_ref[...] += contrib

    # bias + ReLU in f32 (v5e-safe epilogue), then the fused 1x1 heads on the MXU.
    h = jnp.maximum(acc_ref[...] + b1_ref[...], 0.0)
    heads = jnp.dot(h.astype(jnp.bfloat16), wh_ref[...],
                    preferred_element_type=jnp.float32) + bh_ref[...]

    # Lane-dense packed output; fg probability column goes through the EUP
    # (exp + approx reciprocal), everything else is the raw head output.
    a = n_anchor
    col = jax.lax.broadcasted_iota(jnp.int32, heads.shape, 1)
    fg_prob = pl.reciprocal(1.0 + jnp.exp(-heads), approx=True)
    out_ref[0] = jnp.where((col >= 6 * a) & (col < 7 * a), fg_prob, heads)


def rpn_pallas(xp, w1, b1, wh, bh, *, row_tile, w_pad, n_anchor):
    n, hp2, wp2, c = xp.shape
    hh = hp2 - 2
    num_t = hh // row_tile
    assert num_t * row_tile == hh
    tw = row_tile * w_pad
    m_mid = w1.shape[2]
    ow = wh.shape[1]

    kernel = functools.partial(_rpn_kernel, row_tile=row_tile, w_pad=w_pad,
                               n_anchor=n_anchor)

    # Explicit VMEM budget: double-buffered input/output blocks + weights + intermediates.
    in_blk = hp2 * wp2 * c * 4
    w_bytes = (int(w1.size) + int(wh.size)) * 2 + (int(b1.size) + int(bh.size)) * 4
    out_blk = tw * ow * 4
    inter = 6 * tw * max(m_mid, ow) * 4
    est = 2 * in_blk + 2 * w_bytes + 2 * out_blk + inter + (8 << 20)
    vmem_limit = int(min(96 * 1024 * 1024, max(32 * 1024 * 1024, est)))

    def _weight_spec(shape, single_buffer):
        idx = lambda i, t: (0,) * len(shape)
        if single_buffer:
            # grid-invariant weights: no need for a second pipeline buffer
            return pl.BlockSpec(shape, idx, pipeline_mode=pl.Buffered(1))
        return pl.BlockSpec(shape, idx)

    def build(single_buffer):
        return pl.pallas_call(
            kernel,
            out_shape=jax.ShapeDtypeStruct((n, hh * w_pad, ow), jnp.float32),
            grid_spec=pltpu.PrefetchScalarGridSpec(
                num_scalar_prefetch=0,
                grid=(n, num_t),
                in_specs=[
                    # full padded feature map per batch element; block index constant
                    # across row-tiles so it is DMA'd once per image.
                    pl.BlockSpec((1, hp2, wp2, c), lambda i, t: (i, 0, 0, 0)),
                    _weight_spec(w1.shape, single_buffer),
                    _weight_spec(b1.shape, single_buffer),
                    _weight_spec(wh.shape, single_buffer),
                    _weight_spec(bh.shape, single_buffer),
                ],
                out_specs=pl.BlockSpec((1, tw, ow), lambda i, t: (i, t, 0)),
                scratch_shapes=[pltpu.VMEM((tw, m_mid), jnp.float32)],
            ),
            compiler_params=pltpu.CompilerParams(
                dimension_semantics=("parallel", "parallel"),
                vmem_limit_bytes=vmem_limit),
        )(xp, w1, b1, wh, bh)

    try:
        return build(single_buffer=True)
    except Exception:
        # Fallback if this JAX build rejects single-buffered weight BlockSpecs.
        return build(single_buffer=False)


def _pick_row_tile(h, w_pad, max_rows):
    candidates = [th for th in range(1, h + 1)
                  if h % th == 0 and th * w_pad <= max_rows]
    return max(candidates) if candidates else 1


# ----------------------------------------------------------------------------
# Host-side helpers (anchors / loc2bbox / NMS) — NumPy, same semantics as torch code.
# ----------------------------------------------------------------------------
def one_point_generate_anchor(base_size=16, ratios=(0.5, 1, 2), anchor_scales=(8, 16, 32)):
    py = base_size / 2.0
    px = base_size / 2.0
    anchor_base = np.zeros((len(ratios) * len(anchor_scales), 4), dtype=np.float32)
    for i in range(len(ratios)):
        for j in range(len(anchor_scales)):
            h = base_size * anchor_scales[j] * np.sqrt(ratios[i])
            w = base_size * anchor_scales[j] * np.sqrt(1.0 / ratios[i])
            index = i * len(anchor_scales) + j
            anchor_base[index, 0] = py - h / 2.0
            anchor_base[index, 1] = px - w / 2.0
            anchor_base[index, 2] = py + h / 2.0
            anchor_base[index, 3] = px + w / 2.0
    return anchor_base


def _enumerate_shifted_anchor(anchor_base, feat_stride, height, width):
    shift_y = np.arange(0, height * feat_stride, feat_stride)
    shift_x = np.arange(0, width * feat_stride, feat_stride)
    shift_x, shift_y = np.meshgrid(shift_x, shift_y)
    shift = np.stack((shift_y.ravel(), shift_x.ravel(),
                      shift_y.ravel(), shift_x.ravel()), axis=1)
    A = anchor_base.shape[0]
    K = shift.shape[0]
    anchor = anchor_base.reshape((1, A, 4)) + shift.reshape((1, K, 4)).transpose((1, 0, 2))
    anchor = anchor.reshape((K * A, 4)).astype(np.float32)
    return anchor


def loc2bbox(src_bbox, loc):
    if src_bbox.shape[0] == 0:
        return np.zeros((0, 4), dtype=loc.dtype)
    src_height = src_bbox[:, 2] - src_bbox[:, 0]
    src_width = src_bbox[:, 3] - src_bbox[:, 1]
    src_ctr_y = src_bbox[:, 0] + 0.5 * src_height
    src_ctr_x = src_bbox[:, 1] + 0.5 * src_width
    dy = loc[:, 0::4]
    dx = loc[:, 1::4]
    dh = loc[:, 2::4]
    dw = loc[:, 3::4]
    ctr_y = dy * src_height[:, np.newaxis] + src_ctr_y[:, np.newaxis]
    ctr_x = dx * src_width[:, np.newaxis] + src_ctr_x[:, np.newaxis]
    h = np.exp(dh) * src_height[:, np.newaxis]
    w = np.exp(dw) * src_width[:, np.newaxis]
    dst_bbox = np.zeros(loc.shape, dtype=loc.dtype)
    dst_bbox[:, 0::4] = ctr_y - 0.5 * h
    dst_bbox[:, 1::4] = ctr_x - 0.5 * w
    dst_bbox[:, 2::4] = ctr_y + 0.5 * h
    dst_bbox[:, 3::4] = ctr_x + 0.5 * w
    return dst_bbox


def _nms_numpy(boxes, scores, thresh):
    order = scores.argsort()[::-1]
    keep = []
    while order.size > 0:
        i = order[0]
        keep.append(i)
        if order.size == 1:
            break
        rest = order[1:]
        yy1 = np.maximum(boxes[i, 0], boxes[rest, 0])
        xx1 = np.maximum(boxes[i, 1], boxes[rest, 1])
        yy2 = np.minimum(boxes[i, 2], boxes[rest, 2])
        xx2 = np.minimum(boxes[i, 3], boxes[rest, 3])
        ih = np.maximum(0.0, yy2 - yy1)
        iw = np.maximum(0.0, xx2 - xx1)
        inter = ih * iw
        area_i = (boxes[i, 2] - boxes[i, 0]) * (boxes[i, 3] - boxes[i, 1])
        areas = (boxes[rest, 2] - boxes[rest, 0]) * (boxes[rest, 3] - boxes[rest, 1])
        iou = inter / (area_i + areas - inter + 1e-12)
        order = rest[iou <= thresh]
    return np.asarray(keep, dtype=np.int64)


class ProposalCreator:
    def __init__(self, parent_model, nms_thresh=0.7, n_train_pre_nms=12000,
                 n_train_post_nms=2000, n_test_pre_nms=6000, n_test_post_nms=300,
                 min_size=16):
        self.parent_model = parent_model
        self.nms_thresh = nms_thresh
        self.n_train_pre_nms = n_train_pre_nms
        self.n_train_post_nms = n_train_post_nms
        self.n_test_pre_nms = n_test_pre_nms
        self.n_test_post_nms = n_test_post_nms
        self.min_size = min_size

    def __call__(self, loc, score, anchor, img_size, scale=1.0):
        if self.parent_model.training:
            n_pre_nms = self.n_train_pre_nms
            n_post_nms = self.n_train_post_nms
        else:
            n_pre_nms = self.n_test_pre_nms
            n_post_nms = self.n_test_post_nms
        roi = loc2bbox(anchor, loc)
        roi[:, slice(0, 4, 2)] = np.clip(roi[:, slice(0, 4, 2)], 0, img_size[0])
        roi[:, slice(1, 4, 2)] = np.clip(roi[:, slice(1, 4, 2)], 0, img_size[1])
        min_size = self.min_size * scale
        hs = roi[:, 2] - roi[:, 0]
        ws = roi[:, 3] - roi[:, 1]
        keep = np.where((hs >= min_size) & (ws >= min_size))[0]
        roi = roi[keep, :]
        score = score[keep]
        order = score.ravel().argsort()[::-1]
        if n_pre_nms > 0:
            order = order[:n_pre_nms]
        roi = roi[order, :]
        score = score[order]
        # TODO(synk): NMS is data-dependent / dynamic-shape — kept on host (NumPy), no Pallas equivalent.
        keep = _nms_numpy(roi, score, self.nms_thresh)
        if n_post_nms > 0:
            keep = keep[:n_post_nms]
        roi = roi[keep]
        return roi


# ----------------------------------------------------------------------------
# RegionProposalNetwork (JAX / Pallas)
# ----------------------------------------------------------------------------
class RegionProposalNetwork:
    def __init__(self, in_channels=512, mid_channels=512, ratios=(0.5, 1, 2),
                 anchor_scales=(8, 16, 32), feat_stride=16,
                 proposal_creator_params=None, key=None, max_tile_rows=512):
        self.training = True  # matches torch.nn.Module default mode
        self.anchor_base = one_point_generate_anchor(anchor_scales=anchor_scales,
                                                     ratios=ratios)
        self.feat_stride = feat_stride
        self.proposal_layer = ProposalCreator(self, **(proposal_creator_params or {}))
        n_anchor = self.anchor_base.shape[0]
        self.n_anchor = n_anchor
        self.in_channels = in_channels
        self.mid_channels = mid_channels
        self.max_tile_rows = max_tile_rows

        # deterministic "normal_init(m, 0, 0.01)" equivalent, biases zero
        if key is None:
            key = jax.random.PRNGKey(0)
        k1, k2, k3 = jax.random.split(key, 3)
        self.w_conv1 = 0.01 * jax.random.normal(k1, (mid_channels, in_channels, 3, 3),
                                                dtype=jnp.float32)
        self.b_conv1 = jnp.zeros((mid_channels,), jnp.float32)
        self.w_score = 0.01 * jax.random.normal(k2, (n_anchor * 2, mid_channels, 1, 1),
                                                dtype=jnp.float32)
        self.b_score = jnp.zeros((n_anchor * 2,), jnp.float32)
        self.w_loc = 0.01 * jax.random.normal(k3, (n_anchor * 4, mid_channels, 1, 1),
                                              dtype=jnp.float32)
        self.b_loc = jnp.zeros((n_anchor * 4,), jnp.float32)

        # Kernel-friendly layouts: bf16 weights for the MXU, f32 biases for the epilogue.
        C, M, A = in_channels, mid_channels, n_anchor
        # conv1 (O,C,3,3) -> (ky,kx,C,O) -> (9,C,O); tap k = ky*3 + kx
        self.w1_k = jnp.transpose(self.w_conv1, (2, 3, 1, 0)).reshape(9, C, M) \
                       .astype(jnp.bfloat16)
        self.b1_k = self.b_conv1.reshape(1, M).astype(jnp.float32)
        wl = jnp.transpose(self.w_loc[:, :, 0, 0], (1, 0))       # (M, 4A)
        ws = jnp.transpose(self.w_score[:, :, 0, 0], (1, 0))     # (M, 2A)
        wse, wso = ws[:, 0::2], ws[:, 1::2]                      # bg / fg columns
        ow = ((7 * A + 127) // 128) * 128                        # lane-dense padded width
        self.out_width = ow
        wh = jnp.zeros((M, ow), jnp.float32)
        wh = wh.at[:, 0:4 * A].set(wl)
        wh = wh.at[:, 4 * A:5 * A].set(wse)
        wh = wh.at[:, 5 * A:6 * A].set(wso)
        wh = wh.at[:, 6 * A:7 * A].set(wso - wse)                # fg - bg logit column
        self.wh_k = wh.astype(jnp.bfloat16)
        bse, bso = self.b_score[0::2], self.b_score[1::2]
        bh = jnp.zeros((1, ow), jnp.float32)
        bh = bh.at[0, 0:4 * A].set(self.b_loc)
        bh = bh.at[0, 4 * A:5 * A].set(bse)
        bh = bh.at[0, 5 * A:6 * A].set(bso)
        bh = bh.at[0, 6 * A:7 * A].set(bso - bse)
        self.bh_k = bh

    def forward(self, x, img_size, scale=1.0):
        # x: (N, C, H, W) float32, PyTorch NCHW convention
        x = jnp.asarray(x, jnp.float32)
        n, c, hh, ww = x.shape
        anchor = _enumerate_shifted_anchor(np.array(self.anchor_base),
                                           self.feat_stride, hh, ww)
        A = self.n_anchor
        assert anchor.shape[0] // (hh * ww) == A

        # NCHW -> NHWC; conv halo + width padding to a sublane-friendly multiple of 8.
        w_pad = ((ww + 7) // 8) * 8
        x_nhwc = jnp.transpose(x, (0, 2, 3, 1))
        xp = jnp.pad(x_nhwc, ((0, 0), (1, 1), (1, w_pad + 1 - ww), (0, 0)))

        row_tile = _pick_row_tile(hh, w_pad, self.max_tile_rows)
        out = rpn_pallas(xp, self.w1_k, self.b1_k, self.wh_k, self.bh_k,
                         row_tile=row_tile, w_pad=w_pad, n_anchor=A)
        jax.block_until_ready(out)

        # unpack lane-dense output, dropping width padding / unused lanes
        out = out.reshape(n, hh, w_pad, self.out_width)[:, :, :ww, :]
        rpn_locs = out[..., :4 * A].reshape(n, hh * ww * A, 4)
        sbg = out[..., 4 * A:5 * A].reshape(n, -1)
        sfg = out[..., 5 * A:6 * A].reshape(n, -1)
        rpn_scores = jnp.stack([sbg, sfg], axis=-1)              # (N, HWA, 2)
        rpn_fg_scores = out[..., 6 * A:7 * A].reshape(n, -1)     # (N, HWA)

        rois, roi_indices = [], []
        locs_np = np.asarray(rpn_locs)
        fg_np = np.asarray(rpn_fg_scores)
        for i in range(n):
            roi = self.proposal_layer(locs_np[i], fg_np[i], anchor, img_size, scale=scale)
            batch_index = i * np.ones((len(roi),), dtype=np.int32)
            rois.append(roi)
            roi_indices.append(batch_index)
        rois = np.concatenate(rois, axis=0)
        roi_indices = np.concatenate(roi_indices, axis=0)
        return rpn_locs, rpn_scores, rois, roi_indices, anchor


# ----------------------------------------------------------------------------
# pure-jnp reference (same bf16 weights) for a correctness sanity check
# ----------------------------------------------------------------------------
def _reference_heads(x, rpn):
    n, c, hh, ww = x.shape
    A = rpn.n_anchor
    M = rpn.mid_channels
    xb = jnp.transpose(jnp.asarray(x, jnp.float32), (0, 2, 3, 1))
    xb = jnp.pad(xb, ((0, 0), (1, 1), (1, 1), (0, 0)))
    xb = xb.astype(jnp.bfloat16).astype(jnp.float32)
    w1 = rpn.w1_k.astype(jnp.float32)                            # (9, C, M)
    h = jnp.zeros((n, hh, ww, M), jnp.float32)
    for dy in range(3):
        for dx in range(3):
            win = xb[:, dy:dy + hh, dx:dx + ww, :]
            h = h + jnp.einsum('nhwc,cm->nhwm', win, w1[dy * 3 + dx])
    h = jnp.maximum(h + rpn.b1_k.reshape(1, 1, 1, -1), 0.0)
    hb = h.astype(jnp.bfloat16).astype(jnp.float32)
    heads = jnp.einsum('nhwm,mo->nhwo', hb, rpn.wh_k.astype(jnp.float32)) \
        + rpn.bh_k.reshape(1, 1, 1, -1)
    locs = heads[..., :4 * A].reshape(n, -1, 4)
    scores = jnp.stack([heads[..., 4 * A:5 * A].reshape(n, -1),
                        heads[..., 5 * A:6 * A].reshape(n, -1)], axis=-1)
    return locs, scores


# ----------------------------------------------------------------------------
if __name__ == "__main__":
    key = jax.random.PRNGKey(0)
    k_x, k_p = jax.random.split(key)

    # small shapes: N=2, C=32, H=W=8 (feature map), feat_stride=16 -> img 128x128
    N, C, H, W = 2, 32, 8, 8
    MID = 32
    x = jax.random.normal(k_x, (N, C, H, W), dtype=jnp.float32)

    # small max_tile_rows so the (batch, row-tile) grid is actually exercised (grid=(2,2))
    rpn = RegionProposalNetwork(in_channels=C, mid_channels=MID, feat_stride=16,
                                key=k_p, max_tile_rows=32)
    img_size = (H * rpn.feat_stride, W * rpn.feat_stride)

    rpn_locs, rpn_scores, rois, roi_indices, anchor = rpn.forward(x, img_size, scale=1.0)
    jax.block_until_ready(rpn_locs)
    jax.block_until_ready(rpn_scores)

    assert rpn_locs.shape == (N, H * W * 9, 4)
    assert rpn_scores.shape == (N, H * W * 9, 2)
    assert anchor.shape == (H * W * 9, 4)
    assert rois.shape[1] == 4
    assert roi_indices.shape[0] == rois.shape[0]

    # correctness sanity check against a pure-jnp reference using the same bf16 weights
    ref_locs, ref_scores = _reference_heads(x, rpn)
    np.testing.assert_allclose(np.asarray(rpn_locs), np.asarray(ref_locs),
                               rtol=5e-2, atol=2e-3)
    np.testing.assert_allclose(np.asarray(rpn_scores), np.asarray(ref_scores),
                               rtol=5e-2, atol=2e-3)

    print("KERNEL_OK")
</pallas_src>

<mosaic_0001>
module attributes {stable_mosaic.version = 11 : i64} {
  func.func @_rpn_kernel(%arg0: i32, %arg1: i32, %arg2: memref<1x10x10x32xf32, #tpu.memory_space<vmem>>, %arg3: memref<9x32x32xbf16, #tpu.memory_space<vmem>>, %arg4: memref<1x32xf32, #tpu.memory_space<vmem>>, %arg5: memref<32x128xbf16, #tpu.memory_space<vmem>>, %arg6: memref<1x128xf32, #tpu.memory_space<vmem>>, %arg7: memref<1x32x128xf32, #tpu.memory_space<vmem>>, %arg8: memref<32x32xf32, #tpu.memory_space<vmem>>) attributes {dimension_semantics = [#tpu.dimension_semantics<parallel>, #tpu.dimension_semantics<parallel>], iteration_bounds = array<i64: 2, 2>, scalar_prefetch = 0 : i64, scratch_operands = 1 : i64, tpu.core_type = #tpu.core_type<tc>, window_params = [{transform_indices = @transform_0, window_bounds = array<i64: 1, 10, 10, 32>}, {pipeline_mode = #tpu.pipeline_mode<synchronous>, transform_indices = @transform_1, window_bounds = array<i64: 9, 32, 32>}, {pipeline_mode = #tpu.pipeline_mode<synchronous>, transform_indices = @transform_2, window_bounds = array<i64: 1, 32>}, {pipeline_mode = #tpu.pipeline_mode<synchronous>, transform_indices = @transform_3, window_bounds = array<i64: 32, 128>}, {pipeline_mode = #tpu.pipeline_mode<synchronous>, transform_indices = @transform_4, window_bounds = array<i64: 1, 128>}, {transform_indices = @transform_5, window_bounds = array<i64: 1, 32, 128>}]} {
    %c4_i32 = arith.constant 4 : i32
    %0 = arith.muli %arg1, %c4_i32 : i32
    %1 = tpu.assume_multiple %0, 4 : i32
    %c0_i32 = arith.constant 0 : i32
    %2 = arith.addi %1, %c0_i32 : i32
    %c0 = arith.constant 0 : index
    %3 = arith.index_cast %2 : i32 to index
    %c0_0 = arith.constant 0 : index
    %c0_1 = arith.constant 0 : index
    %4 = vector.load %arg2[%c0, %3, %c0_0, %c0_1] : memref<1x10x10x32xf32, #tpu.memory_space<vmem>>, vector<1x4x10x32xf32>
    %5 = vector.shape_cast %4 : vector<1x4x10x32xf32> to vector<4x10x32xf32>
    %6 = vector.extract_strided_slice %5 {offsets = [0, 0, 0], sizes = [4, 8, 32], strides = [1, 1, 1]} : vector<4x10x32xf32> to vector<4x8x32xf32>
    %7 = vector.shape_cast %6 : vector<4x8x32xf32> to vector<32x32xf32>
    %8 = arith.truncf %7 : vector<32x32xf32> to vector<32x32xbf16>
    %c0_2 = arith.constant 0 : index
    %c0_3 = arith.constant 0 : index
    %c0_4 = arith.constant 0 : index
    %9 = vector.load %arg3[%c0_2, %c0_3, %c0_4] : memref<9x32x32xbf16, #tpu.memory_space<vmem>>, vector<1x32x32xbf16>
    %10 = vector.shape_cast %9 : vector<1x32x32xbf16> to vector<32x32xbf16>
    %cst = arith.constant dense<0.000000e+00> : vector<32x32xf32>
    %11 = tpu.matmul %8, %10, %cst {dimension_numbers = #tpu.dot_dimension_numbers<[1], [0], [0], [1], [0, 0, 1, 1], [], []>} : vector<32x32xbf16>, vector<32x32xbf16>, vector<32x32xf32> -> vector<32x32xf32>
    %c0_5 = arith.constant 0 : index
    %c0_6 = arith.constant 0 : index
    %12 = vector.load %arg8[%c0_5, %c0_6] : memref<32x32xf32, #tpu.memory_space<vmem>>, vector<32x32xf32>
    tpu.vector_store %arg8[%c0_5, %c0_6], %11 {strides = array<i32>} : memref<32x32xf32, #tpu.memory_space<vmem>>, vector<32x32xf32>,
    %13 = vector.extract_strided_slice %5 {offsets = [0, 1, 0], sizes = [4, 8, 32], strides = [1, 1, 1]} : vector<4x10x32xf32> to vector<4x8x32xf32>
    %14 = vector.shape_cast %13 : vector<4x8x32xf32> to vector<32x32xf32>
    %15 = arith.truncf %14 : vector<32x32xf32> to vector<32x32xbf16>
    %c1 = arith.constant 1 : index
    %c0_7 = arith.constant 0 : index
    %c0_8 = arith.constant 0 : index
    %16 = vector.load %arg3[%c1, %c0_7, %c0_8] : memref<9x32x32xbf16, #tpu.memory_space<vmem>>, vector<1x32x32xbf16>
    %17 = vector.shape_cast %16 : vector<1x32x32xbf16> to vector<32x32xbf16>
    %cst_9 = arith.constant dense<0.000000e+00> : vector<32x32xf32>
    %18 = tpu.matmul %15, %17, %cst_9 {dimension_numbers = #tpu.dot_dimension_numbers<[1], [0], [0], [1], [0, 0, 1, 1], [], []>} : vector<32x32xbf16>, vector<32x32xbf16>, vector<32x32xf32> -> vector<32x32xf32>
    %c0_10 = arith.constant 0 : index
    %c0_11 = arith.constant 0 : index
    %19 = vector.load %arg8[%c0_10, %c0_11] : memref<32x32xf32, #tpu.memory_space<vmem>>, vector<32x32xf32>
    %20 = arith.addf %19, %18 : vector<32x32xf32>
    %c0_12 = arith.constant 0 : index
    %c0_13 = arith.constant 0 : index
    %21 = vector.load %arg8[%c0_12, %c0_13] : memref<32x32xf32, #tpu.memory_space<vmem>>, vector<32x32xf32>
    tpu.vector_store %arg8[%c0_12, %c0_13], %20 {strides = array<i32>} : memref<32x32xf32, #tpu.memory_space<vmem>>, vector<32x32xf32>,
    %22 = vector.extract_strided_slice %5 {offsets = [0, 2, 0], sizes = [4, 8, 32], strides = [1, 1, 1]} : vector<4x10x32xf32> to vector<4x8x32xf32>
    %23 = vector.shape_cast %22 : vector<4x8x32xf32> to vector<32x32xf32>
    %24 = arith.truncf %23 : vector<32x32xf32> to vector<32x32xbf16>
    %c2 = arith.constant 2 : index
    %c0_14 = arith.constant 0 : index
    %c0_15 = arith.constant 0 : index
    %25 = vector.load %arg3[%c2, %c0_14, %c0_15] : memref<9x32x32xbf16, #tpu.memory_space<vmem>>, vector<1x32x32xbf16>
    %26 = vector.shape_cast %25 : vector<1x32x32xbf16> to vector<32x32xbf16>
    %cst_16 = arith.constant dense<0.000000e+00> : vector<32x32xf32>
    %27 = tpu.matmul %24, %26, %cst_16 {dimension_numbers = #tpu.dot_dimension_numbers<[1], [0], [0], [1], [0, 0, 1, 1], [], []>} : vector<32x32xbf16>, vector<32x32xbf16>, vector<32x32xf32> -> vector<32x32xf32>
    %c0_17 = arith.constant 0 : index
    %c0_18 = arith.constant 0 : index
    %28 = vector.load %arg8[%c0_17, %c0_18] : memref<32x32xf32, #tpu.memory_space<vmem>>, vector<32x32xf32>
    %29 = arith.addf %28, %27 : vector<32x32xf32>
    %c0_19 = arith.constant 0 : index
    %c0_20 = arith.constant 0 : index
    %30 = vector.load %arg8[%c0_19, %c0_20] : memref<32x32xf32, #tpu.memory_space<vmem>>, vector<32x32xf32>
    tpu.vector_store %arg8[%c0_19, %c0_20], %29 {strides = array<i32>} : memref<32x32xf32, #tpu.memory_space<vmem>>, vector<32x32xf32>,
    %c1_i32 = arith.constant 1 : i32
    %31 = arith.addi %1, %c1_i32 : i32
    %c0_21 = arith.constant 0 : index
    %32 = arith.index_cast %31 : i32 to index
    %c0_22 = arith.constant 0 : index
    %c0_23 = arith.constant 0 : index
    %33 = vector.load %arg2[%c0_21, %32, %c0_22, %c0_23] : memref<1x10x10x32xf32, #tpu.memory_space<vmem>>, vector<1x4x10x32xf32>
    %34 = vector.shape_cast %33 : vector<1x4x10x32xf32> to vector<4x10x32xf32>
    %35 = vector.extract_strided_slice %34 {offsets = [0, 0, 0], sizes = [4, 8, 32], strides = [1, 1, 1]} : vector<4x10x32xf32> to vector<4x8x32xf32>
    %36 = vector.shape_cast %35 : vector<4x8x32xf32> to vector<32x32xf32>
    %37 = arith.truncf %36 : vector<32x32xf32> to vector<32x32xbf16>
    %c3 = arith.constant 3 : index
    %c0_24 = arith.constant 0 : index
    %c0_25 = arith.constant 0 : index
    %38 = vector.load %arg3[%c3, %c0_24, %c0_25] : memref<9x32x32xbf16, #tpu.memory_space<vmem>>, vector<1x32x32xbf16>
    %39 = vector.shape_cast %38 : vector<1x32x32xbf16> to vector<32x32xbf16>
    %cst_26 = arith.constant dense<0.000000e+00> : vector<32x32xf32>
    %40 = tpu.matmul %37, %39, %cst_26 {dimension_numbers = #tpu.dot_dimension_numbers<[1], [0], [0], [1], [0, 0, 1, 1], [], []>} : vector<32x32xbf16>, vector<32x32xbf16>, vector<32x32xf32> -> vector<32x32xf32>
    %c0_27 = arith.constant 0 : index
    %c0_28 = arith.constant 0 : index
    %41 = vector.load %arg8[%c0_27, %c0_28] : memref<32x32xf32, #tpu.memory_space<vmem>>, vector<32x32xf32>
    %42 = arith.addf %41, %40 : vector<32x32xf32>
    %c0_29 = arith.constant 0 : index
    %c0_30 = arith.constant 0 : index
    %43 = vector.load %arg8[%c0_29, %c0_30] : memref<32x32xf32, #tpu.memory_space<vmem>>, vector<32x32xf32>
    tpu.vector_store %arg8[%c0_29, %c0_30], %42 {strides = array<i32>} : memref<32x32xf32, #tpu.memory_space<vmem>>, vector<32x32xf32>,
    %44 = vector.extract_strided_slice %34 {offsets = [0, 1, 0], sizes = [4, 8, 32], strides = [1, 1, 1]} : vector<4x10x32xf32> to vector<4x8x32xf32>
    %45 = vector.shape_cast %44 : vector<4x8x32xf32> to vector<32x32xf32>
    %46 = arith.truncf %45 : vector<32x32xf32> to vector<32x32xbf16>
    %c4 = arith.constant 4 : index
    %c0_31 = arith.constant 0 : index
    %c0_32 = arith.constant 0 : index
    %47 = vector.load %arg3[%c4, %c0_31, %c0_32] : memref<9x32x32xbf16, #tpu.memory_space<vmem>>, vector<1x32x32xbf16>
    %48 = vector.shape_cast %47 : vector<1x32x32xbf16> to vector<32x32xbf16>
    %cst_33 = arith.constant dense<0.000000e+00> : vector<32x32xf32>
    %49 = tpu.matmul %46, %48, %cst_33 {dimension_numbers = #tpu.dot_dimension_numbers<[1], [0], [0], [1], [0, 0, 1, 1], [], []>} : vector<32x32xbf16>, vector<32x32xbf16>, vector<32x32xf32> -> vector<32x32xf32>
    %c0_34 = arith.constant 0 : index
    %c0_35 = arith.constant 0 : index
    %50 = vector.load %arg8[%c0_34, %c0_35] : memref<32x32xf32, #tpu.memory_space<vmem>>, vector<32x32xf32>
    %51 = arith.addf %50, %49 : vector<32x32xf32>
    %c0_36 = arith.constant 0 : index
    %c0_37 = arith.constant 0 : index
    %52 = vector.load %arg8[%c0_36, %c0_37] : memref<32x32xf32, #tpu.memory_space<vmem>>, vector<32x32xf32>
    tpu.vector_store %arg8[%c0_36, %c0_37], %51 {strides = array<i32>} : memref<32x32xf32, #tpu.memory_space<vmem>>, vector<32x32xf32>,
    %53 = vector.extract_strided_slice %34 {offsets = [0, 2, 0], sizes = [4, 8, 32], strides = [1, 1, 1]} : vector<4x10x32xf32> to vector<4x8x32xf32>
    %54 = vector.shape_cast %53 : vector<4x8x32xf32> to vector<32x32xf32>
    %55 = arith.truncf %54 : vector<32x32xf32> to vector<32x32xbf16>
    %c5 = arith.constant 5 : index
    %c0_38 = arith.constant 0 : index
    %c0_39 = arith.constant 0 : index
    %56 = vector.load %arg3[%c5, %c0_38, %c0_39] : memref<9x32x32xbf16, #tpu.memory_space<vmem>>, vector<1x32x32xbf16>
    %57 = vector.shape_cast %56 : vector<1x32x32xbf16> to vector<32x32xbf16>
    %cst_40 = arith.constant dense<0.000000e+00> : vector<32x32xf32>
    %58 = tpu.matmul %55, %57, %cst_40 {dimension_numbers = #tpu.dot_dimension_numbers<[1], [0], [0], [1], [0, 0, 1, 1], [], []>} : vector<32x32xbf16>, vector<32x32xbf16>, vector<32x32xf32> -> vector<32x32xf32>
    %c0_41 = arith.constant 0 : index
    %c0_42 = arith.constant 0 : index
    %59 = vector.load %arg8[%c0_41, %c0_42] : memref<32x32xf32, #tpu.memory_space<vmem>>, vector<32x32xf32>
    %60 = arith.addf %59, %58 : vector<32x32xf32>
    %c0_43 = arith.constant 0 : index
    %c0_44 = arith.constant 0 : index
    %61 = vector.load %arg8[%c0_43, %c0_44] : memref<32x32xf32, #tpu.memory_space<vmem>>, vector<32x32xf32>
    tpu.vector_store %arg8[%c0_43, %c0_44], %60 {strides = array<i32>} : memref<32x32xf32, #tpu.memory_space<vmem>>, vector<32x32xf32>,
    %c2_i32 = arith.constant 2 : i32
    %62 = arith.addi %1, %c2_i32 : i32
    %c0_45 = arith.constant 0 : index
    %63 = arith.index_cast %62 : i32 to index
    %c0_46 = arith.constant 0 : index
    %c0_47 = arith.constant 0 : index
    %64 = vector.load %arg2[%c0_45, %63, %c0_46, %c0_47] : memref<1x10x10x32xf32, #tpu.memory_space<vmem>>, vector<1x4x10x32xf32>
    %65 = vector.shape_cast %64 : vector<1x4x10x32xf32> to vector<4x10x32xf32>
    %66 = vector.extract_strided_slice %65 {offsets = [0, 0, 0], sizes = [4, 8, 32], strides = [1, 1, 1]} : vector<4x10x32xf32> to vector<4x8x32xf32>
    %67 = vector.shape_cast %66 : vector<4x8x32xf32> to vector<32x32xf32>
    %68 = arith.truncf %67 : vector<32x32xf32> to vector<32x32xbf16>
    %c6 = arith.constant 6 : index
    %c0_48 = arith.constant 0 : index
    %c0_49 = arith.constant 0 : index
    %69 = vector.load %arg3[%c6, %c0_48, %c0_49] : memref<9x32x32xbf16, #tpu.memory_space<vmem>>, vector<1x32x32xbf16>
    %70 = vector.shape_cast %69 : vector<1x32x32xbf16> to vector<32x32xbf16>
    %cst_50 = arith.constant dense<0.000000e+00> : vector<32x32xf32>
    %71 = tpu.matmul %68, %70, %cst_50 {dimension_numbers = #tpu.dot_dimension_numbers<[1], [0], [0], [1], [0, 0, 1, 1], [], []>} : vector<32x32xbf16>, vector<32x32xbf16>, vector<32x32xf32> -> vector<32x32xf32>
    %c0_51 = arith.constant 0 : index
    %c0_52 = arith.constant 0 : index
    %72 = vector.load %arg8[%c0_51, %c0_52] : memref<32x32xf32, #tpu.memory_space<vmem>>, vector<32x32xf32>
    %73 = arith.addf %72, %71 : vector<32x32xf32>
    %c0_53 = arith.constant 0 : index
    %c0_54 = arith.constant 0 : index
    %74 = vector.load %arg8[%c0_53, %c0_54] : memref<32x32xf32, #tpu.memory_space<vmem>>, vector<32x32xf32>
    tpu.vector_store %arg8[%c0_53, %c0_54], %73 {strides = array<i32>} : memref<32x32xf32, #tpu.memory_space<vmem>>, vector<32x32xf32>,
    %75 = vector.extract_strided_slice %65 {offsets = [0, 1, 0], sizes = [4, 8, 32], strides = [1, 1, 1]} : vector<4x10x32xf32> to vector<4x8x32xf32>
    %76 = vector.shape_cast %75 : vector<4x8x32xf32> to vector<32x32xf32>
    %77 = arith.truncf %76 : vector<32x32xf32> to vector<32x32xbf16>
    %c7 = arith.constant 7 : index
    %c0_55 = arith.constant 0 : index
    %c0_56 = arith.constant 0 : index
    %78 = vector.load %arg3[%c7, %c0_55, %c0_56] : memref<9x32x32xbf16, #tpu.memory_space<vmem>>, vector<1x32x32xbf16>
    %79 = vector.shape_cast %78 : vector<1x32x32xbf16> to vector<32x32xbf16>
    %cst_57 = arith.constant dense<0.000000e+00> : vector<32x32xf32>
    %80 = tpu.matmul %77, %79, %cst_57 {dimension_numbers = #tpu.dot_dimension_numbers<[1], [0], [0], [1], [0, 0, 1, 1], [], []>} : vector<32x32xbf16>, vector<32x32xbf16>, vector<32x32xf32> -> vector<32x32xf32>
    %c0_58 = arith.constant 0 : index
    %c0_59 = arith.constant 0 : index
    %81 = vector.load %arg8[%c0_58, %c0_59] : memref<32x32xf32, #tpu.memory_space<vmem>>, vector<32x32xf32>
    %82 = arith.addf %81, %80 : vector<32x32xf32>
    %c0_60 = arith.constant 0 : index
    %c0_61 = arith.constant 0 : index
    %83 = vector.load %arg8[%c0_60, %c0_61] : memref<32x32xf32, #tpu.memory_space<vmem>>, vector<32x32xf32>
    tpu.vector_store %arg8[%c0_60, %c0_61], %82 {strides = array<i32>} : memref<32x32xf32, #tpu.memory_space<vmem>>, vector<32x32xf32>,
    %84 = vector.extract_strided_slice %65 {offsets = [0, 2, 0], sizes = [4, 8, 32], strides = [1, 1, 1]} : vector<4x10x32xf32> to vector<4x8x32xf32>
    %85 = vector.shape_cast %84 : vector<4x8x32xf32> to vector<32x32xf32>
    %86 = arith.truncf %85 : vector<32x32xf32> to vector<32x32xbf16>
    %c8 = arith.constant 8 : index
    %c0_62 = arith.constant 0 : index
    %c0_63 = arith.constant 0 : index
    %87 = vector.load %arg3[%c8, %c0_62, %c0_63] : memref<9x32x32xbf16, #tpu.memory_space<vmem>>, vector<1x32x32xbf16>
    %88 = vector.shape_cast %87 : vector<1x32x32xbf16> to vector<32x32xbf16>
    %cst_64 = arith.constant dense<0.000000e+00> : vector<32x32xf32>
    %89 = tpu.matmul %86, %88, %cst_64 {dimension_numbers = #tpu.dot_dimension_numbers<[1], [0], [0], [1], [0, 0, 1, 1], [], []>} : vector<32x32xbf16>, vector<32x32xbf16>, vector<32x32xf32> -> vector<32x32xf32>
    %c0_65 = arith.constant 0 : index
    %c0_66 = arith.constant 0 : index
    %90 = vector.load %arg8[%c0_65, %c0_66] : memref<32x32xf32, #tpu.memory_space<vmem>>, vector<32x32xf32>
    %91 = arith.addf %90, %89 : vector<32x32xf32>
    %c0_67 = arith.constant 0 : index
    %c0_68 = arith.constant 0 : index
    %92 = vector.load %arg8[%c0_67, %c0_68] : memref<32x32xf32, #tpu.memory_space<vmem>>, vector<32x32xf32>
    tpu.vector_store %arg8[%c0_67, %c0_68], %91 {strides = array<i32>} : memref<32x32xf32, #tpu.memory_space<vmem>>, vector<32x32xf32>,
    %c0_69 = arith.constant 0 : index
    %c0_70 = arith.constant 0 : index
    %93 = vector.load %arg8[%c0_69, %c0_70] : memref<32x32xf32, #tpu.memory_space<vmem>>, vector<32x32xf32>
    %c0_71 = arith.constant 0 : index
    %c0_72 = arith.constant 0 : index
    %94 = vector.load %arg4[%c0_71, %c0_72] : memref<1x32xf32, #tpu.memory_space<vmem>>, vector<1x32xf32>
    %95 = vector.broadcast %94 : vector<1x32xf32> to vector<32x32xf32>
    %96 = arith.addf %93, %95 : vector<32x32xf32>
    %cst_73 = arith.constant 0.000000e+00 : f32
    %97 = vector.broadcast %cst_73 : f32 to vector<32x32xf32>
    %98 = arith.maximumf %96, %97 : vector<32x32xf32>
    %99 = arith.truncf %98 : vector<32x32xf32> to vector<32x32xbf16>
    %c0_74 = arith.constant 0 : index
    %c0_75 = arith.constant 0 : index
    %100 = vector.load %arg5[%c0_74, %c0_75] : memref<32x128xbf16, #tpu.memory_space<vmem>>, vector<32x128xbf16>
    %cst_76 = arith.constant dense<0.000000e+00> : vector<32x128xf32>
    %101 = tpu.matmul %99, %100, %cst_76 {dimension_numbers = #tpu.dot_dimension_numbers<[1], [0], [0], [1], [0, 0, 1, 1], [], []>} : vector<32x32xbf16>, vector<32x128xbf16>, vector<32x128xf32> -> vector<32x128xf32>
    %c0_77 = arith.constant 0 : index
    %c0_78 = arith.constant 0 : index
    %102 = vector.load %arg6[%c0_77, %c0_78] : memref<1x128xf32, #tpu.memory_space<vmem>>, vector<1x128xf32>
    %103 = vector.broadcast %102 : vector<1x128xf32> to vector<32x128xf32>
    %104 = arith.addf %101, %103 : vector<32x128xf32>
    %105 = tpu.iota {dimensions = array<i32: 1>} : vector<32x128xi32>
    %cst_79 = arith.constant 0.000000e+00 : f32
    %106 = vector.broadcast %cst_79 : f32 to vector<32x128xf32>
    %107 = arith.subf %106, %104 : vector<32x128xf32>
    %108 = math.exp %107 : vector<32x128xf32>
    %cst_80 = arith.constant 1.000000e+00 : f32
    %109 = vector.broadcast %cst_80 : f32 to vector<32x128xf32>
    %110 = arith.addf %109, %108 : vector<32x128xf32>
    %111 = tpu.reciprocal %110 {approx = true} : vector<32x128xf32> -> vector<32x128xf32>
    %c54_i32 = arith.constant 54 : i32
    %112 = vector.broadcast %c54_i32 : i32 to vector<32x128xi32>
    %113 = arith.cmpi sge, %105, %112 : vector<32x128xi32>
    %c63_i32 = arith.constant 63 : i32
    %114 = vector.broadcast %c63_i32 : i32 to vector<32x128xi32>
    %115 = arith.cmpi slt, %105, %114 : vector<32x128xi32>
    %116 = arith.andi %113, %115 : vector<32x128xi1>
    %117 = arith.select %116, %111, %104 : vector<32x128xi1>, vector<32x128xf32>
    %c0_81 = arith.constant 0 : index
    %c0_82 = arith.constant 0 : index
    %c0_83 = arith.constant 0 : index
    %118 = vector.load %arg7[%c0_81, %c0_82, %c0_83] : memref<1x32x128xf32, #tpu.memory_space<vmem>>, vector<1x32x128xf32>
    %119 = vector.shape_cast %118 : vector<1x32x128xf32> to vector<32x128xf32>
    %120 = vector.shape_cast %117 : vector<32x128xf32> to vector<1x32x128xf32>
    tpu.vector_store %arg7[%c0_81, %c0_82, %c0_83], %120 {strides = array<i32>} : memref<1x32x128xf32, #tpu.memory_space<vmem>>, vector<1x32x128xf32>,
    return
  }
  func.func @transform_0(%arg0: i32, %arg1: i32) -> (i32, i32, i32, i32) {
    %c0_i32 = arith.constant 0 : i32
    %c0_i32_0 = arith.constant 0 : i32
    %c0_i32_1 = arith.constant 0 : i32
    %c0_i32_2 = arith.constant 0 : i32
    return %arg0, %c0_i32, %c0_i32_0, %c0_i32_1 : i32, i32, i32, i32
  }
  func.func @transform_1(%arg0: i32, %arg1: i32) -> (i32, i32, i32) {
    %c0_i32 = arith.constant 0 : i32
    %c0_i32_0 = arith.constant 0 : i32
    %c0_i32_1 = arith.constant 0 : i32
    %c0_i32_2 = arith.constant 0 : i32
    return %c0_i32, %c0_i32_0, %c0_i32_1 : i32, i32, i32
  }
  func.func @transform_2(%arg0: i32, %arg1: i32) -> (i32, i32) {
    %c0_i32 = arith.constant 0 : i32
    %c0_i32_0 = arith.constant 0 : i32
    %c0_i32_1 = arith.constant 0 : i32
    return %c0_i32, %c0_i32_0 : i32, i32
  }
  func.func @transform_3(%arg0: i32, %arg1: i32) -> (i32, i32) {
    %c0_i32 = arith.constant 0 : i32
    %c0_i32_0 = arith.constant 0 : i32
    %c0_i32_1 = arith.constant 0 : i32
    return %c0_i32, %c0_i32_0 : i32, i32
  }
  func.func @transform_4(%arg0: i32, %arg1: i32) -> (i32, i32) {
    %c0_i32 = arith.constant 0 : i32
    %c0_i32_0 = arith.constant 0 : i32
    %c0_i32_1 = arith.constant 0 : i32
    return %c0_i32, %c0_i32_0 : i32, i32
  }
  func.func @transform_5(%arg0: i32, %arg1: i32) -> (i32, i32, i32) {
    %c0_i32 = arith.constant 0 : i32
    %c0_i32_0 = arith.constant 0 : i32
    return %arg0, %arg1, %c0_i32 : i32, i32, i32
  }
}

module attributes {stable_mosaic.version = 11 : i64} {
  func.func @_rpn_kernel(%arg0: i32, %arg1: i32, %arg2: memref<1x10x10x32xf32, #tpu.memory_space<vmem>>, %arg3: memref<9x32x32xbf16, #tpu.memory_space<vmem>>, %arg4: memref<1x32xf32, #tpu.memory_space<vmem>>, %arg5: memref<32x128xbf16, #tpu.memory_space<vmem>>, %arg6: memref<1x128xf32, #tpu.memory_space<vmem>>, %arg7: memref<1x32x128xf32, #tpu.memory_space<vmem>>, %arg8: memref<32x32xf32, #tpu.memory_space<vmem>>) attributes {dimension_semantics = [#tpu.dimension_semantics<parallel>, #tpu.dimension_semantics<parallel>], iteration_bounds = array<i64: 2, 2>, scalar_prefetch = 0 : i64, scratch_operands = 1 : i64, tpu.core_type = #tpu.core_type<tc>, window_params = [{transform_indices = @transform_0, window_bounds = array<i64: 1, 10, 10, 32>}, {pipeline_mode = #tpu.pipeline_mode<synchronous>, transform_indices = @transform_1, window_bounds = array<i64: 9, 32, 32>}, {pipeline_mode = #tpu.pipeline_mode<synchronous>, transform_indices = @transform_2, window_bounds = array<i64: 1, 32>}, {pipeline_mode = #tpu.pipeline_mode<synchronous>, transform_indices = @transform_3, window_bounds = array<i64: 32, 128>}, {pipeline_mode = #tpu.pipeline_mode<synchronous>, transform_indices = @transform_4, window_bounds = array<i64: 1, 128>}, {transform_indices = @transform_5, window_bounds = array<i64: 1, 32, 128>}]} {
    %c4_i32 = arith.constant 4 : i32
    %0 = arith.muli %arg1, %c4_i32 : i32
    %1 = tpu.assume_multiple %0, 4 : i32
    %c0_i32 = arith.constant 0 : i32
    %2 = arith.addi %1, %c0_i32 : i32
    %c0 = arith.constant 0 : index
    %3 = arith.index_cast %2 : i32 to index
    %c0_0 = arith.constant 0 : index
    %c0_1 = arith.constant 0 : index
    %4 = vector.load %arg2[%c0, %3, %c0_0, %c0_1] : memref<1x10x10x32xf32, #tpu.memory_space<vmem>>, vector<1x4x10x32xf32>
    %5 = vector.shape_cast %4 : vector<1x4x10x32xf32> to vector<4x10x32xf32>
    %6 = vector.extract_strided_slice %5 {offsets = [0, 0, 0], sizes = [4, 8, 32], strides = [1, 1, 1]} : vector<4x10x32xf32> to vector<4x8x32xf32>
    %7 = vector.shape_cast %6 : vector<4x8x32xf32> to vector<32x32xf32>
    %8 = arith.truncf %7 : vector<32x32xf32> to vector<32x32xbf16>
    %c0_2 = arith.constant 0 : index
    %c0_3 = arith.constant 0 : index
    %c0_4 = arith.constant 0 : index
    %9 = vector.load %arg3[%c0_2, %c0_3, %c0_4] : memref<9x32x32xbf16, #tpu.memory_space<vmem>>, vector<1x32x32xbf16>
    %10 = vector.shape_cast %9 : vector<1x32x32xbf16> to vector<32x32xbf16>
    %cst = arith.constant dense<0.000000e+00> : vector<32x32xf32>
    %11 = tpu.matmul %8, %10, %cst {dimension_numbers = #tpu.dot_dimension_numbers<[1], [0], [0], [1], [0, 0, 1, 1], [], []>} : vector<32x32xbf16>, vector<32x32xbf16>, vector<32x32xf32> -> vector<32x32xf32>
    %c0_5 = arith.constant 0 : index
    %c0_6 = arith.constant 0 : index
    %12 = vector.load %arg8[%c0_5, %c0_6] : memref<32x32xf32, #tpu.memory_space<vmem>>, vector<32x32xf32>
    tpu.vector_store %arg8[%c0_5, %c0_6], %11 {strides = array<i32>} : memref<32x32xf32, #tpu.memory_space<vmem>>, vector<32x32xf32>,
    %13 = vector.extract_strided_slice %5 {offsets = [0, 1, 0], sizes = [4, 8, 32], strides = [1, 1, 1]} : vector<4x10x32xf32> to vector<4x8x32xf32>
    %14 = vector.shape_cast %13 : vector<4x8x32xf32> to vector<32x32xf32>
    %15 = arith.truncf %14 : vector<32x32xf32> to vector<32x32xbf16>
    %c1 = arith.constant 1 : index
    %c0_7 = arith.constant 0 : index
    %c0_8 = arith.constant 0 : index
    %16 = vector.load %arg3[%c1, %c0_7, %c0_8] : memref<9x32x32xbf16, #tpu.memory_space<vmem>>, vector<1x32x32xbf16>
    %17 = vector.shape_cast %16 : vector<1x32x32xbf16> to vector<32x32xbf16>
    %cst_9 = arith.constant dense<0.000000e+00> : vector<32x32xf32>
    %18 = tpu.matmul %15, %17, %cst_9 {dimension_numbers = #tpu.dot_dimension_numbers<[1], [0], [0], [1], [0, 0, 1, 1], [], []>} : vector<32x32xbf16>, vector<32x32xbf16>, vector<32x32xf32> -> vector<32x32xf32>
    %c0_10 = arith.constant 0 : index
    %c0_11 = arith.constant 0 : index
    %19 = vector.load %arg8[%c0_10, %c0_11] : memref<32x32xf32, #tpu.memory_space<vmem>>, vector<32x32xf32>
    %20 = arith.addf %19, %18 : vector<32x32xf32>
    %c0_12 = arith.constant 0 : index
    %c0_13 = arith.constant 0 : index
    %21 = vector.load %arg8[%c0_12, %c0_13] : memref<32x32xf32, #tpu.memory_space<vmem>>, vector<32x32xf32>
    tpu.vector_store %arg8[%c0_12, %c0_13], %20 {strides = array<i32>} : memref<32x32xf32, #tpu.memory_space<vmem>>, vector<32x32xf32>,
    %22 = vector.extract_strided_slice %5 {offsets = [0, 2, 0], sizes = [4, 8, 32], strides = [1, 1, 1]} : vector<4x10x32xf32> to vector<4x8x32xf32>
    %23 = vector.shape_cast %22 : vector<4x8x32xf32> to vector<32x32xf32>
    %24 = arith.truncf %23 : vector<32x32xf32> to vector<32x32xbf16>
    %c2 = arith.constant 2 : index
    %c0_14 = arith.constant 0 : index
    %c0_15 = arith.constant 0 : index
    %25 = vector.load %arg3[%c2, %c0_14, %c0_15] : memref<9x32x32xbf16, #tpu.memory_space<vmem>>, vector<1x32x32xbf16>
    %26 = vector.shape_cast %25 : vector<1x32x32xbf16> to vector<32x32xbf16>
    %cst_16 = arith.constant dense<0.000000e+00> : vector<32x32xf32>
    %27 = tpu.matmul %24, %26, %cst_16 {dimension_numbers = #tpu.dot_dimension_numbers<[1], [0], [0], [1], [0, 0, 1, 1], [], []>} : vector<32x32xbf16>, vector<32x32xbf16>, vector<32x32xf32> -> vector<32x32xf32>
    %c0_17 = arith.constant 0 : index
    %c0_18 = arith.constant 0 : index
    %28 = vector.load %arg8[%c0_17, %c0_18] : memref<32x32xf32, #tpu.memory_space<vmem>>, vector<32x32xf32>
    %29 = arith.addf %28, %27 : vector<32x32xf32>
    %c0_19 = arith.constant 0 : index
    %c0_20 = arith.constant 0 : index
    %30 = vector.load %arg8[%c0_19, %c0_20] : memref<32x32xf32, #tpu.memory_space<vmem>>, vector<32x32xf32>
    tpu.vector_store %arg8[%c0_19, %c0_20], %29 {strides = array<i32>} : memref<32x32xf32, #tpu.memory_space<vmem>>, vector<32x32xf32>,
    %c1_i32 = arith.constant 1 : i32
    %31 = arith.addi %1, %c1_i32 : i32
    %c0_21 = arith.constant 0 : index
    %32 = arith.index_cast %31 : i32 to index
    %c0_22 = arith.constant 0 : index
    %c0_23 = arith.constant 0 : index
    %33 = vector.load %arg2[%c0_21, %32, %c0_22, %c0_23] : memref<1x10x10x32xf32, #tpu.memory_space<vmem>>, vector<1x4x10x32xf32>
    %34 = vector.shape_cast %33 : vector<1x4x10x32xf32> to vector<4x10x32xf32>
    %35 = vector.extract_strided_slice %34 {offsets = [0, 0, 0], sizes = [4, 8, 32], strides = [1, 1, 1]} : vector<4x10x32xf32> to vector<4x8x32xf32>
    %36 = vector.shape_cast %35 : vector<4x8x32xf32> to vector<32x32xf32>
    %37 = arith.truncf %36 : vector<32x32xf32> to vector<32x32xbf16>
    %c3 = arith.constant 3 : index
    %c0_24 = arith.constant 0 : index
    %c0_25 = arith.constant 0 : index
    %38 = vector.load %arg3[%c3, %c0_24, %c0_25] : memref<9x32x32xbf16, #tpu.memory_space<vmem>>, vector<1x32x32xbf16>
    %39 = vector.shape_cast %38 : vector<1x32x32xbf16> to vector<32x32xbf16>
    %cst_26 = arith.constant dense<0.000000e+00> : vector<32x32xf32>
    %40 = tpu.matmul %37, %39, %cst_26 {dimension_numbers = #tpu.dot_dimension_numbers<[1], [0], [0], [1], [0, 0, 1, 1], [], []>} : vector<32x32xbf16>, vector<32x32xbf16>, vector<32x32xf32> -> vector<32x32xf32>
    %c0_27 = arith.constant 0 : index
    %c0_28 = arith.constant 0 : index
    %41 = vector.load %arg8[%c0_27, %c0_28] : memref<32x32xf32, #tpu.memory_space<vmem>>, vector<32x32xf32>
    %42 = arith.addf %41, %40 : vector<32x32xf32>
    %c0_29 = arith.constant 0 : index
    %c0_30 = arith.constant 0 : index
    %43 = vector.load %arg8[%c0_29, %c0_30] : memref<32x32xf32, #tpu.memory_space<vmem>>, vector<32x32xf32>
    tpu.vector_store %arg8[%c0_29, %c0_30], %42 {strides = array<i32>} : memref<32x32xf32, #tpu.memory_space<vmem>>, vector<32x32xf32>,
    %44 = vector.extract_strided_slice %34 {offsets = [0, 1, 0], sizes = [4, 8, 32], strides = [1, 1, 1]} : vector<4x10x32xf32> to vector<4x8x32xf32>
    %45 = vector.shape_cast %44 : vector<4x8x32xf32> to vector<32x32xf32>
    %46 = arith.truncf %45 : vector<32x32xf32> to vector<32x32xbf16>
    %c4 = arith.constant 4 : index
    %c0_31 = arith.constant 0 : index
    %c0_32 = arith.constant 0 : index
    %47 = vector.load %arg3[%c4, %c0_31, %c0_32] : memref<9x32x32xbf16, #tpu.memory_space<vmem>>, vector<1x32x32xbf16>
    %48 = vector.shape_cast %47 : vector<1x32x32xbf16> to vector<32x32xbf16>
    %cst_33 = arith.constant dense<0.000000e+00> : vector<32x32xf32>
    %49 = tpu.matmul %46, %48, %cst_33 {dimension_numbers = #tpu.dot_dimension_numbers<[1], [0], [0], [1], [0, 0, 1, 1], [], []>} : vector<32x32xbf16>, vector<32x32xbf16>, vector<32x32xf32> -> vector<32x32xf32>
    %c0_34 = arith.constant 0 : index
    %c0_35 = arith.constant 0 : index
    %50 = vector.load %arg8[%c0_34, %c0_35] : memref<32x32xf32, #tpu.memory_space<vmem>>, vector<32x32xf32>
    %51 = arith.addf %50, %49 : vector<32x32xf32>
    %c0_36 = arith.constant 0 : index
    %c0_37 = arith.constant 0 : index
    %52 = vector.load %arg8[%c0_36, %c0_37] : memref<32x32xf32, #tpu.memory_space<vmem>>, vector<32x32xf32>
    tpu.vector_store %arg8[%c0_36, %c0_37], %51 {strides = array<i32>} : memref<32x32xf32, #tpu.memory_space<vmem>>, vector<32x32xf32>,
    %53 = vector.extract_strided_slice %34 {offsets = [0, 2, 0], sizes = [4, 8, 32], strides = [1, 1, 1]} : vector<4x10x32xf32> to vector<4x8x32xf32>
    %54 = vector.shape_cast %53 : vector<4x8x32xf32> to vector<32x32xf32>
    %55 = arith.truncf %54 : vector<32x32xf32> to vector<32x32xbf16>
    %c5 = arith.constant 5 : index
    %c0_38 = arith.constant 0 : index
    %c0_39 = arith.constant 0 : index
    %56 = vector.load %arg3[%c5, %c0_38, %c0_39] : memref<9x32x32xbf16, #tpu.memory_space<vmem>>, vector<1x32x32xbf16>
    %57 = vector.shape_cast %56 : vector<1x32x32xbf16> to vector<32x32xbf16>
    %cst_40 = arith.constant dense<0.000000e+00> : vector<32x32xf32>
    %58 = tpu.matmul %55, %57, %cst_40 {dimension_numbers = #tpu.dot_dimension_numbers<[1], [0], [0], [1], [0, 0, 1, 1], [], []>} : vector<32x32xbf16>, vector<32x32xbf16>, vector<32x32xf32> -> vector<32x32xf32>
    %c0_41 = arith.constant 0 : index
    %c0_42 = arith.constant 0 : index
    %59 = vector.load %arg8[%c0_41, %c0_42] : memref<32x32xf32, #tpu.memory_space<vmem>>, vector<32x32xf32>
    %60 = arith.addf %59, %58 : vector<32x32xf32>
    %c0_43 = arith.constant 0 : index
    %c0_44 = arith.constant 0 : index
    %61 = vector.load %arg8[%c0_43, %c0_44] : memref<32x32xf32, #tpu.memory_space<vmem>>, vector<32x32xf32>
    tpu.vector_store %arg8[%c0_43, %c0_44], %60 {strides = array<i32>} : memref<32x32xf32, #tpu.memory_space<vmem>>, vector<32x32xf32>,
    %c2_i32 = arith.constant 2 : i32
    %62 = arith.addi %1, %c2_i32 : i32
    %c0_45 = arith.constant 0 : index
    %63 = arith.index_cast %62 : i32 to index
    %c0_46 = arith.constant 0 : index
    %c0_47 = arith.constant 0 : index
    %64 = vector.load %arg2[%c0_45, %63, %c0_46, %c0_47] : memref<1x10x10x32xf32, #tpu.memory_space<vmem>>, vector<1x4x10x32xf32>
    %65 = vector.shape_cast %64 : vector<1x4x10x32xf32> to vector<4x10x32xf32>
    %66 = vector.extract_strided_slice %65 {offsets = [0, 0, 0], sizes = [4, 8, 32], strides = [1, 1, 1]} : vector<4x10x32xf32> to vector<4x8x32xf32>
    %67 = vector.shape_cast %66 : vector<4x8x32xf32> to vector<32x32xf32>
    %68 = arith.truncf %67 : vector<32x32xf32> to vector<32x32xbf16>
    %c6 = arith.constant 6 : index
    %c0_48 = arith.constant 0 : index
    %c0_49 = arith.constant 0 : index
    %69 = vector.load %arg3[%c6, %c0_48, %c0_49] : memref<9x32x32xbf16, #tpu.memory_space<vmem>>, vector<1x32x32xbf16>
    %70 = vector.shape_cast %69 : vector<1x32x32xbf16> to vector<32x32xbf16>
    %cst_50 = arith.constant dense<0.000000e+00> : vector<32x32xf32>
    %71 = tpu.matmul %68, %70, %cst_50 {dimension_numbers = #tpu.dot_dimension_numbers<[1], [0], [0], [1], [0, 0, 1, 1], [], []>} : vector<32x32xbf16>, vector<32x32xbf16>, vector<32x32xf32> -> vector<32x32xf32>
    %c0_51 = arith.constant 0 : index
    %c0_52 = arith.constant 0 : index
    %72 = vector.load %arg8[%c0_51, %c0_52] : memref<32x32xf32, #tpu.memory_space<vmem>>, vector<32x32xf32>
    %73 = arith.addf %72, %71 : vector<32x32xf32>
    %c0_53 = arith.constant 0 : index
    %c0_54 = arith.constant 0 : index
    %74 = vector.load %arg8[%c0_53, %c0_54] : memref<32x32xf32, #tpu.memory_space<vmem>>, vector<32x32xf32>
    tpu.vector_store %arg8[%c0_53, %c0_54], %73 {strides = array<i32>} : memref<32x32xf32, #tpu.memory_space<vmem>>, vector<32x32xf32>,
    %75 = vector.extract_strided_slice %65 {offsets = [0, 1, 0], sizes = [4, 8, 32], strides = [1, 1, 1]} : vector<4x10x32xf32> to vector<4x8x32xf32>
    %76 = vector.shape_cast %75 : vector<4x8x32xf32> to vector<32x32xf32>
    %77 = arith.truncf %76 : vector<32x32xf32> to vector<32x32xbf16>
    %c7 = arith.constant 7 : index
    %c0_55 = arith.constant 0 : index
    %c0_56 = arith.constant 0 : index
    %78 = vector.load %arg3[%c7, %c0_55, %c0_56] : memref<9x32x32xbf16, #tpu.memory_space<vmem>>, vector<1x32x32xbf16>
    %79 = vector.shape_cast %78 : vector<1x32x32xbf16> to vector<32x32xbf16>
    %cst_57 = arith.constant dense<0.000000e+00> : vector<32x32xf32>
    %80 = tpu.matmul %77, %79, %cst_57 {dimension_numbers = #tpu.dot_dimension_numbers<[1], [0], [0], [1], [0, 0, 1, 1], [], []>} : vector<32x32xbf16>, vector<32x32xbf16>, vector<32x32xf32> -> vector<32x32xf32>
    %c0_58 = arith.constant 0 : index
    %c0_59 = arith.constant 0 : index
    %81 = vector.load %arg8[%c0_58, %c0_59] : memref<32x32xf32, #tpu.memory_space<vmem>>, vector<32x32xf32>
    %82 = arith.addf %81, %80 : vector<32x32xf32>
    %c0_60 = arith.constant 0 : index
    %c0_61 = arith.constant 0 : index
    %83 = vector.load %arg8[%c0_60, %c0_61] : memref<32x32xf32, #tpu.memory_space<vmem>>, vector<32x32xf32>
    tpu.vector_store %arg8[%c0_60, %c0_61], %82 {strides = array<i32>} : memref<32x32xf32, #tpu.memory_space<vmem>>, vector<32x32xf32>,
    %84 = vector.extract_strided_slice %65 {offsets = [0, 2, 0], sizes = [4, 8, 32], strides = [1, 1, 1]} : vector<4x10x32xf32> to vector<4x8x32xf32>
    %85 = vector.shape_cast %84 : vector<4x8x32xf32> to vector<32x32xf32>
    %86 = arith.truncf %85 : vector<32x32xf32> to vector<32x32xbf16>
    %c8 = arith.constant 8 : index
    %c0_62 = arith.constant 0 : index
    %c0_63 = arith.constant 0 : index
    %87 = vector.load %arg3[%c8, %c0_62, %c0_63] : memref<9x32x32xbf16, #tpu.memory_space<vmem>>, vector<1x32x32xbf16>
    %88 = vector.shape_cast %87 : vector<1x32x32xbf16> to vector<32x32xbf16>
    %cst_64 = arith.constant dense<0.000000e+00> : vector<32x32xf32>
    %89 = tpu.matmul %86, %88, %cst_64 {dimension_numbers = #tpu.dot_dimension_numbers<[1], [0], [0], [1], [0, 0, 1, 1], [], []>} : vector<32x32xbf16>, vector<32x32xbf16>, vector<32x32xf32> -> vector<32x32xf32>
    %c0_65 = arith.constant 0 : index
    %c0_66 = arith.constant 0 : index
    %90 = vector.load %arg8[%c0_65, %c0_66] : memref<32x32xf32, #tpu.memory_space<vmem>>, vector<32x32xf32>
    %91 = arith.addf %90, %89 : vector<32x32xf32>
    %c0_67 = arith.constant 0 : index
    %c0_68 = arith.constant 0 : index
    %92 = vector.load %arg8[%c0_67, %c0_68] : memref<32x32xf32, #tpu.memory_space<vmem>>, vector<32x32xf32>
    tpu.vector_store %arg8[%c0_67, %c0_68], %91 {strides = array<i32>} : memref<32x32xf32, #tpu.memory_space<vmem>>, vector<32x32xf32>,
    %c0_69 = arith.constant 0 : index
    %c0_70 = arith.constant 0 : index
    %93 = vector.load %arg8[%c0_69, %c0_70] : memref<32x32xf32, #tpu.memory_space<vmem>>, vector<32x32xf32>
    %c0_71 = arith.constant 0 : index
    %c0_72 = arith.constant 0 : index
    %94 = vector.load %arg4[%c0_71, %c0_72] : memref<1x32xf32, #tpu.memory_space<vmem>>, vector<1x32xf32>
    %95 = vector.broadcast %94 : vector<1x32xf32> to vector<32x32xf32>
    %96 = arith.addf %93, %95 : vector<32x32xf32>
    %cst_73 = arith.constant 0.000000e+00 : f32
    %97 = vector.broadcast %cst_73 : f32 to vector<32x32xf32>
    %98 = arith.maximumf %96, %97 : vector<32x32xf32>
    %99 = arith.truncf %98 : vector<32x32xf32> to vector<32x32xbf16>
    %c0_74 = arith.constant 0 : index
    %c0_75 = arith.constant 0 : index
    %100 = vector.load %arg5[%c0_74, %c0_75] : memref<32x128xbf16, #tpu.memory_space<vmem>>, vector<32x128xbf16>
    %cst_76 = arith.constant dense<0.000000e+00> : vector<32x128xf32>
    %101 = tpu.matmul %99, %100, %cst_76 {dimension_numbers = #tpu.dot_dimension_numbers<[1], [0], [0], [1], [0, 0, 1, 1], [], []>} : vector<32x32xbf16>, vector<32x128xbf16>, vector<32x128xf32> -> vector<32x128xf32>
    %c0_77 = arith.constant 0 : index
    %c0_78 = arith.constant 0 : index
    %102 = vector.load %arg6[%c0_77, %c0_78] : memref<1x128xf32, #tpu.memory_space<vmem>>, vector<1x128xf32>
    %103 = vector.broadcast %102 : vector<1x128xf32> to vector<32x128xf32>
    %104 = arith.addf %101, %103 : vector<32x128xf32>
    %105 = tpu.iota {dimensions = array<i32: 1>} : vector<32x128xi32>
    %cst_79 = arith.constant 0.000000e+00 : f32
    %106 = vector.broadcast %cst_79 : f32 to vector<32x128xf32>
    %107 = arith.subf %106, %104 : vector<32x128xf32>
    %108 = math.exp %107 : vector<32x128xf32>
    %cst_80 = arith.constant 1.000000e+00 : f32
    %109 = vector.broadcast %cst_80 : f32 to vector<32x128xf32>
    %110 = arith.addf %109, %108 : vector<32x128xf32>
    %111 = tpu.reciprocal %110 {approx = true} : vector<32x128xf32> -> vector<32x128xf32>
    %c54_i32 = arith.constant 54 : i32
    %112 = vector.broadcast %c54_i32 : i32 to vector<32x128xi32>
    %113 = arith.cmpi sge, %105, %112 : vector<32x128xi32>
    %c63_i32 = arith.constant 63 : i32
    %114 = vector.broadcast %c63_i32 : i32 to vector<32x128xi32>
    %115 = arith.cmpi slt, %105, %114 : vector<32x128xi32>
    %116 = arith.andi %113, %115 : vector<32x128xi1>
    %117 = arith.select %116, %111, %104 : vector<32x128xi1>, vector<32x128xf32>
    %c0_81 = arith.constant 0 : index
    %c0_82 = arith.constant 0 : index
    %c0_83 = arith.constant 0 : index
    %118 = vector.load %arg7[%c0_81, %c0_82, %c0_83] : memref<1x32x128xf32, #tpu.memory_space<vmem>>, vector<1x32x128xf32>
    %119 = vector.shape_cast %118 : vector<1x32x128xf32> to vector<32x128xf32>
    %120 = vector.shape_cast %117 : vector<32x128xf32> to vector<1x32x128xf32>
    tpu.vector_store %arg7[%c0_81, %c0_82, %c0_83], %120 {strides = array<i32>} : memref<1x32x128xf32, #tpu.memory_space<vmem>>, vector<1x32x128xf32>,
    return
  }
  func.func @transform_0(%arg0: i32, %arg1: i32) -> (i32, i32, i32, i32) {
    %c0_i32 = arith.constant 0 : i32
    %c0_i32_0 = arith.constant 0 : i32
    %c0_i32_1 = arith.constant 0 : i32
    %c0_i32_2 = arith.constant 0 : i32
    return %arg0, %c0_i32, %c0_i32_0, %c0_i32_1 : i32, i32, i32, i32
  }
  func.func @transform_1(%arg0: i32, %arg1: i32) -> (i32, i32, i32) {
    %c0_i32 = arith.constant 0 : i32
    %c0_i32_0 = arith.constant 0 : i32
    %c0_i32_1 = arith.constant 0 : i32
    %c0_i32_2 = arith.constant 0 : i32
    return %c0_i32, %c0_i32_0, %c0_i32_1 : i32, i32, i32
  }
  func.func @transform_2(%arg0: i32, %arg1: i32) -> (i32, i32) {
    %c0_i32 = arith.constant 0 : i32
    %c0_i32_0 = arith.constant 0 : i32
    %c0_i32_1 = arith.constant 0 : i32
    return %c0_i32, %c0_i32_0 : i32, i32
  }
  func.func @transform_3(%arg0: i32, %arg1: i32) -> (i32, i32) {
    %c0_i32 = arith.constant 0 : i32
    %c0_i32_0 = arith.constant 0 : i32
    %c0_i32_1 = arith.constant 0 : i32
    return %c0_i32, %c0_i32_0 : i32, i32
  }
  func.func @transform_4(%arg0: i32, %arg1: i32) -> (i32, i32) {
    %c0_i32 = arith.constant 0 : i32
    %c0_i32_0 = arith.constant 0 : i32
    %c0_i32_1 = arith.constant 0 : i32
    return %c0_i32, %c0_i32_0 : i32, i32
  }
  func.func @transform_5(%arg0: i32, %arg1: i32) -> (i32, i32, i32) {
    %c0_i32 = arith.constant 0 : i32
    %c0_i32_0 = arith.constant 0 : i32
    return %arg0, %arg1, %c0_i32 : i32, i32, i32
  }
}

</mosaic_0001>

<bundles_post_ra>
// kernel: tpu_custom_call.1
= control target key start
LH: loop header
LB: loop body
LE: loop exit
PB: predicated region body
PF: predicated region fallthrough
CT: control target
= control target key end

     0   :  { %10 = vsyncpa [#allocation4], 0  ;;  %s2243_s0 = inlined_call_operand.vmem [shape: f32[2,10,10,32], index: 0, kind: input, shape index: {}]   ;;  %s2244_s1 = inlined_call_operand.vmem [shape: bf16[9,32,32], index: 1, kind: input, shape index: {}]   ;;  %s2245_s2 = inlined_call_operand.vmem [shape: f32[1,32], index: 2, kind: input, shape index: {}]   ;;  %s2246_s3 = inlined_call_operand.vmem [shape: bf16[32,128], index: 3, kind: input, shape index: {}]   ;;  %s2247_s4 = inlined_call_operand.vmem [shape: f32[1,128], index: 4, kind: input, shape index: {}]   ;;  %s2248_s5 = inlined_call_operand.hbm [shape: f32[2,64,128], index: 5, kind: output, shape index: {}]  }
   0x1   :  { %12 = vsyncpa [#allocation4 + $0x1], 0  ;;  %s1863_s18 = smov 0   ;;  %s1865_s19 = smov 0  }
   0x2   :  { %s1867_s20 = smov 0   ;;  %s1869_s21 = smov 0  }
   0x3   :  { %s1871_s22 = smov 0   ;;  %s1873_s23 = smov 0  }
   0x4   :  { %s1875_s24 = smov 0   ;;  %s1877_s25 = smov 0  }
   0x5 LB: > { %s1394_s26 = sadd.s32 4294967295, %s1828_s25   ;;  %s1395_s27 = sadd.s32 4294967294, %s1828_s25   ;;  %s1828_s25 = sphi %s1877_s25, %s18_s25   ;;  %s1824_s24 = sphi %s1875_s24, %s2262_s24   ;;  %s1820_s23 = sphi %s1873_s23, %s2261_s23   ;;  %s1816_s22 = sphi %s1871_s22, %s2260_s22   ;;  %s1812_s21 = sphi %s1869_s21, %s2259_s21   ;;  %s1808_s20 = sphi %s1867_s20, %s2258_s20   ;;  %s1804_s19 = sphi %s1865_s19, %s2257_s19   ;;  %s1800_s18 = sphi %s1863_s18, %s2256_s18  }
   0x6   : > { %s27_s28 = sadd.s32 1, %s1820_s23  ;;  %s30_s29 = sadd.s32 1, %s1824_s24 }
   0x7   : > { %p28_p0 = scmp.ge.s32.totalorder %s27_s28, 2  ;;  %p159_p1 = scmp.ne.s32.totalorder %s1808_s20, %s1804_s19 }
   0x8   : > { %p160_p2 = scmp.eq.s32.totalorder %s1394_s26, 3  ;;  %p165_p5 = scmp.ne.s32.totalorder %s1804_s19, %s1800_s18 }
   0x9   : > { %s2264_s28 = smov (%p28_p0, %s27_s28), 0  ;;  %s2266_s29 = smov (!%p28_p0, %s30_s29), %s1824_s24 }
   0xa   : > { %s145_s30 = ssub.s32 %s1820_s23, %s2264_s28  ;;  %p1914_p3 = por %p160_p2, %p159_p1 }
   0xb   : > { %p32_p4 = scmp.ge.s32.totalorder %s2266_s29, 2  ;;  %p166_p6 = scmp.eq.s32.totalorder %s1395_s27, 3 }
   0xc   : > { %p1398_p7 = scmp.ge.s32.totalorder %s1828_s25, 1  ;;  %p204_p9 = scmp.lt.s32.totalorder %s1828_s25, 5 }
   0xd   : > { %s2268_s29 = smov (%p32_p4, %s2266_s29), 0  ;;  %p1923_p8 = por %p166_p6, %p165_p5 }
   0xe   : > { %2251 = sst [smem:[#allocation6_spill]] %s2268_s29  ;;  %s144_s8 = ssub.s32 %s1824_s24, %s2268_s29 }
   0xf   : > { %s149_s9 = sadd.s32 1, %s1808_s20  ;;  %s146_s10 = sor.u32 %s145_s30, %s144_s8 }
  0x10   : > { %p205_p10 = pnand %p1398_p7, %p204_p9  ;;  %p147_p11 = scmp.eq.s32.totalorder %s146_s10, 0 }
  0x11   : > { %p232_p12 = scmp.lt.s32.totalorder (!%p205_p10), %s1816_s22, 1  ;;  %s229_s12 = sand.u32 (!%p205_p10), 1, %s1804_s19  }
  0x12   : > { %s1932_s11 = scalar_select %p147_p11, %s1808_s20, %s149_s9  }
  0x13   : > { %208 = sbr.rel (%p205_p10) target bundleno = 578 (0x242), region = 40  ;;  %s1503_s9 = sshll.u32 (!%p205_p10), %s1812_s21, 6 }
  0x14   : > { %s1498_s13 = sshll.u32 (!%p205_p10), %s1812_s21, 2  ;;  %s1499_s14 = sshll.u32 (!%p205_p10), %s1816_s22, 3 }
  0x15   : > { %s2192_s30 = scalar_lea.sflag (!%p205_p10), [#allocation4], %s229_s12 }
  0x18   : > { %v1700_v0 = vld [vmem:[%s2244_s1 + $0x8] sm:$0xff]   ;;  %v1701_v1 = vld [vmem:[%s2244_s1 + $0x18] sm:$0xff]   ;;  %v1702_v2 = vld [vmem:[%s2244_s1] sm:$0xff]   ;;  %s233_s26 = scalar_select %p232_p12, %s1816_s22, 1  ;;  %vm268_vm0 = vcmask 261120   ;;  %vm336_vm1 = vcmask 1046528  }
  0x19   : > { %1546 = vmatprep.subr.bf16.mxu0 %v1700_v0  ;;  %1554 = vmatprep.subr.bf16.mxu1 %v1701_v1  ;;  %v1703_v3 = vld [vmem:[%s2244_s1 + $0x10] sm:$0xff]   ;;  %v1704_v4 = vld [vmem:[%s2244_s1 + $0x28] sm:$0xff]   ;;  %v1960_v5 = vld [vmem:[%s2244_s1 + $0x38] sm:$0xff]   ;;  %vm439_vm2 = vcmask 1045504  }
  0x1a   : > { %1547 = vmatpush3.bf16.msra.mxu0 %v1700_v0  ;;  %1555 = vmatpush3.bf16.msra.mxu1 %v1701_v1  ;;  %s1626_s8 = smul.u32 160, %s233_s26  ;;  %v1705_v20 = vld [vmem:[%s2244_s1 + $0x20] sm:$0xff]   ;;  %v1708_v35 = vld [vmem:[%s2244_s1 + $0x48] sm:$0xff]   ;;  %v1707_v40 = vld [vmem:[%s2244_s1 + $0x30] sm:$0xff]  }
  0x1b   : > { %1548 = vmatprep.subr.bf16.mxu0 %v1702_v2  ;;  %1556 = vmatprep.subr.bf16.mxu1 %v1703_v3  ;;  %v1709_v56 = vld [vmem:[%s2244_s1 + $0x40] sm:$0xff]   ;;  %v1710_v0 = vld [vmem:[%s2244_s1 + $0x58] sm:$0xff]  }
  0x1c   : > { %s236_s15 = scalar_lea.vmem %s2243_s0, %s1626_s8 }
  0x1d   : > { %s1955_s16 = scalar_lea.vmem %s236_s15, %s1503_s9  ;;  %s1305_s15 = sadd.s32 %s1499_s14, %s1498_s13 }
  0x1e   : > { %1549 = vmatpush3.bf16.msra.mxu0 %v1702_v2  ;;  %v242_v6 = vld [vmem:[%s1955_s16] sm:$0xff]  ;;  %v1964_v7 = vld [vmem:[%s1955_s16 + $0x10] sm:$0xff]  ;;  %1557 = vmatpush3.bf16.msra.mxu1 %v1703_v3  ;;  %v243_v14 = vld [vmem:[%s1955_s16 + $0x8] sm:$0x3]  ;;  %s1500_s26 = sshll.u32 %s1305_s15, 7  ;;  %s1830_s9 = smov [#allocation3]  }
  0x1f   : > { %v1967_v8 = vld [vmem:[%s1955_s16 + $0x20] sm:$0xff]  ;;  %1562 = vmatprep.subr.bf16.mxu0 %v1704_v4  ;;  %v250_v9 = vpack.c.bf16 %v1964_v7, %v242_v6  ;;  %v337_v10 = vrot.slane %v242_v6, 1  ;;  %v340_v11 = vrot.slane %v1964_v7, 1  ;;  %v440_v12 = vrot.slane %v242_v6, 2  ;;  %v1972_v13 = vld [vmem:[%s1955_s16 + $0x30] sm:$0xff]  ;;  %1570 = vmatprep.subr.bf16.mxu1 %v1960_v5  ;;  %s2188_s27 = scalar_lea.hbm %s2248_s5, %s1500_s26  ;;  %s1740_s10 = sshll.u32 %s1830_s9, 4  ;;  %s1741_s10 = int_to_ptr.vmem [resolvable:$false] %s1740_s10 }
  0x20   : > { %v443_v15 = vrot.slane %v1964_v7, 2  ;;  %v1979_v16 = vpack.c.bf16 %v1972_v13, %v1967_v8  ;;  %v1982_v17 = vrot.slane %v1967_v8, 1  ;;  %v1985_v18 = vrot.slane %v1972_v13, 1  ;;  %v245_v19 = vld [vmem:[%s1955_s16 + $0x18] sm:$0x3]  ;;  %v2023_v45 = vld [vmem:[%s1955_s16 + $0x40] sm:$0xff] }
  0x21   : > { %1550 = vmatprep.mubr.msk.bf16.mxu0 %vm268_vm0, %v250_v9  ;;  %v1993_v21 = vrot.slane %v1967_v8, 2  ;;  %v1996_v22 = vrot.slane %v1972_v13, 2  ;;  %v338_v23 = vrot.slane %v243_v14, 1  ;;  %v341_v24 = vrot.slane %v245_v19, 1  ;;  %v247_v25 = vld [vmem:[%s1955_s16 + $0x28] sm:$0x3] }
  0x22   : > { %1551 = vmatmul.mubr.msk.bf16.vlgmr.msra.gmra.mxu0 %vm268_vm0, %v1979_v16  ;;  %v441_v26 = vrot.slane %v243_v14, 2  ;;  %v444_v27 = vrot.slane %v245_v19, 2  ;;  %v249_v28 = vld [vmem:[%s1955_s16 + $0x38] sm:$0x3]  ;;  %v344_v29 = vrot.slane %v247_v25, 1  ;;  %v447_v30 = vrot.slane %v247_v25, 2 }
  0x23   : > { %v339_v31 = vsel %vm336_vm1, %v337_v10, %v338_v23  ;;  %v342_v32 = vsel %vm336_vm1, %v340_v11, %v341_v24  ;;  %v347_v33 = vrot.slane %v249_v28, 1  ;;  %v450_v34 = vrot.slane %v249_v28, 2  ;;  %1563 = vmatpush3.bf16.msra.mxu0 %v1704_v4  ;;  %v1426_v46 = vld [vmem:[%s1955_s16 + $0x18] sm:$0x3]  ;;  %v1428_v47 = vld [vmem:[%s1955_s16 + $0x28] sm:$0x3] }
  0x24   : > { %v353_v36 = vpack.c.bf16 %v342_v32, %v339_v31  ;;  %v345_v37 = vsel %vm336_vm1, %v1982_v17, %v344_v29  ;;  %1564 = vmatprep.subr.bf16.mxu0 %v1705_v20  ;;  %v442_v38 = vsel %vm439_vm2, %v440_v12, %v441_v26  ;;  %v445_v39 = vsel %vm439_vm2, %v443_v15, %v444_v27  ;;  %v1430_v51 = vld [vmem:[%s1955_s16 + $0x38] sm:$0x3]  ;;  %v1432_v52 = vld [vmem:[%s1955_s16 + $0x48] sm:$0x3]  ;;  %v1711_v12 = vld [vmem:[%s2244_s1 + $0x50] sm:$0xff]  }
  0x25   : > { %v348_v41 = vsel %vm336_vm1, %v1985_v18, %v347_v33  ;;  %v456_v42 = vpack.c.bf16 %v445_v39, %v442_v38  ;;  %v448_v43 = vsel %vm439_vm2, %v1993_v21, %v447_v30  ;;  %v451_v44 = vsel %vm439_vm2, %v1996_v22, %v450_v34  ;;  %v1462_v14 = vld [vmem:[%s1955_s16 + $0x38] sm:$0x3]  ;;  %v1464_v23 = vld [vmem:[%s1955_s16 + $0x48] sm:$0x3]  ;;  %v1465_v32 = vld [vmem:[%s1955_s16 + $0x50] sm:$0xff] }
  0x26   : > { %1558 = vmatprep.mubr.msk.bf16.mxu1 %vm268_vm0, %v353_v36  ;;  %v354_v48 = vpack.c.bf16 %v348_v41, %v345_v37  ;;  %v457_v49 = vpack.c.bf16 %v451_v44, %v448_v43  ;;  %v553_v50 = vpack.c.bf16 %v1967_v8, %v1964_v7  ;;  %v656_v53 = vrot.slane %v2023_v45, 1  ;;  %v1712_v8 = vld [vmem:[%s2244_s1 + $0x68] sm:$0xff]   ;;  %v1466_v24 = vld [vmem:[%s1955_s16 + $0x58] sm:$0x3]  ;;  %v1715_v39 = vld [vmem:[%s2244_s1 + $0x70] sm:$0xff]  }
  0x27   : > { %1565 = vmatpush3.bf16.msra.mxu0 %v1705_v20  ;;  %1566 = vmatprep.mubr.msk.bf16.mxu0 %vm268_vm0, %v456_v42  ;;  %v648_v54 = vrot.slane %v1426_v46, 1  ;;  %v651_v55 = vrot.slane %v1428_v47, 1  ;;  %v654_v57 = vrot.slane %v1430_v51, 1  ;;  %v657_v58 = vrot.slane %v1432_v52, 1  ;;  %v1714_v28 = vld [vmem:[%s2244_s1 + $0x78] sm:$0xff]   ;;  %v1716_v34 = vld [vmem:[%s2244_s1 + $0x88] sm:$0xff]  }
  0x28   : > { %1559 = vmatmul.mubr.msk.bf16.vlgmr.msra.gmra.mxu1 %vm268_vm0, %v354_v48  ;;  %1578 = vmatprep.subr.bf16.mxu0 %v1708_v35  ;;  %v750_v61 = vrot.slane %v1426_v46, 2  ;;  %v753_v62 = vrot.slane %v1428_v47, 2  ;;  %v758_v6 = vrot.slane %v2023_v45, 2  ;;  %v756_v9 = vrot.slane %v1430_v51, 2 }
  0x29   : > { %1571 = vmatpush3.bf16.msra.mxu1 %v1960_v5  ;;  %1574 = vmatprep.mubr.msk.bf16.mxu1 %vm268_vm0, %v553_v50  ;;  %v649_v59 = vsel %vm336_vm1, %v340_v11, %v648_v54  ;;  %v652_v60 = vsel %vm336_vm1, %v1982_v17, %v651_v55  ;;  %v655_v1 = vsel %vm336_vm1, %v1985_v18, %v654_v57  ;;  %v759_v10 = vrot.slane %v1432_v52, 2  ;;  %v1718_v50 = vld [vmem:[%s2246_s3 + $0x8] sm:$0xff]  }
  0x2a   : > { %1567 = vmatmul.mubr.msk.bf16.vlgmr.msra.gmra.mxu0 %vm268_vm0, %v457_v49  ;;  %1572 = vmatprep.subr.bf16.mxu1 %v1707_v40  ;;  %v663_v63 = vpack.c.bf16 %v652_v60, %v649_v59  ;;  %v658_v2 = vsel %vm336_vm1, %v656_v53, %v657_v58  ;;  %v751_v3 = vsel %vm439_vm2, %v443_v15, %v750_v61  ;;  %v1713_v15 = vld [vmem:[%s2244_s1 + $0x60] sm:$0xff]   ;;  %v960_v20 = vrot.slane %v1462_v14, 1 }
  0x2b   : > { %1579 = vmatpush3.bf16.msra.mxu0 %v1708_v35  ;;  %v754_v4 = vsel %vm439_vm2, %v1993_v21, %v753_v62  ;;  %v554_v5 = vpack.c.bf16 %v2023_v45, %v1972_v13  ;;  %v664_v11 = vpack.c.bf16 %v658_v2, %v655_v1  ;;  %v1460_v13 = vld [vmem:[%s1955_s16 + $0x28] sm:$0x3]  ;;  %v757_v25 = vsel %vm439_vm2, %v1996_v22, %v756_v9  ;;  %s1399_s16 = sshll.u32 %s229_s12, 5 }
  0x2c   : > { %1580 = vmatprep.subr.bf16.mxu0 %v1709_v56  ;;  %1582 = vmatprep.mubr.msk.bf16.mxu0 %vm268_vm0, %v663_v63  ;;  %v765_v7 = vpack.c.bf16 %v754_v4, %v751_v3  ;;  %v957_v19 = vrot.slane %v1460_v13, 1  ;;  %v760_v26 = vsel %vm439_vm2, %v758_v6, %v759_v10  ;;  %v1059_v27 = vrot.slane %v1460_v13, 2  ;;  %s231_s17 = scalar_lea.vmem [#allocation3], %s1399_s16  ;;  %s1742_s16 = scalar_lea.vmem %s1741_s10, 1024 }
  0x2d   : > { %1573 = vmatpush3.bf16.msra.mxu1 %v1707_v40  ;;  %v961_v30 = vsel %vm336_vm1, %v1985_v18, %v960_v20  ;;  %v1062_v31 = vrot.slane %v1462_v14, 2  ;;  %v766_v33 = vpack.c.bf16 %v760_v26, %v757_v25  ;;  %v965_v18 = vrot.slane %v1465_v32, 1  ;;  %s1308_s29 = sshll.u32 %s231_s17, 4  ;;  %s2181_s29 = int_to_ptr.vmem [resolvable:$true] %s1308_s29 }
  0x2e   : > { %1586 = vmatprep.subr.bf16.mxu1 %v1710_v0  ;;  %v958_v29 = vsel %vm336_vm1, %v1982_v17, %v957_v19  ;;  %v1060_v35 = vsel %vm439_vm2, %v1993_v21, %v1059_v27  ;;  %v963_v37 = vrot.slane %v1464_v23, 1  ;;  %v966_v38 = vrot.slane %v1466_v24, 1  ;;  %s1736_s8 = scalar_lea.vmem %s2181_s29, 512  ;;  %p1743_p2 = scmp.lt.s32.totalorder %s2181_s29, %s1741_s10 }
  0x2f   : > { %1581 = vmatpush3.bf16.msra.mxu0 %v1709_v56  ;;  %v1063_v17 = vsel %vm439_vm2, %v1996_v22, %v1062_v31  ;;  %v972_v36 = vpack.c.bf16 %v961_v30, %v958_v29  ;;  %v1067_v40 = vrot.slane %v1465_v32, 2  ;;  %v1065_v42 = vrot.slane %v1464_v23, 2  ;;  %v1717_v22 = vld [vmem:[%s2244_s1 + $0x80] sm:$0xff]   ;;  %p1737_p13 = scmp.ne.s32.totalorder %s2181_s29, %s1736_s8  ;;  %p1744_p4 = scmp.lt.s32.totalorder %s1742_s16, %s1736_s8 }
  0x30   : > { %1575 = vmatmul.mubr.msk.bf16.vlgmr.msra.gmra.mxu1 %vm268_vm0, %v554_v5  ;;  %1594 = vmatprep.subr.bf16.mxu0 %v1712_v8  ;;  %v1074_v41 = vpack.c.bf16 %v1063_v17, %v1060_v35  ;;  %v1068_v21 = vrot.slane %v1466_v24, 2  ;;  %v964_v43 = vsel %vm336_vm1, %v656_v53, %v963_v37  ;;  %v967_v44 = vsel %vm336_vm1, %v965_v18, %v966_v38 }
  0x31   : > { %1587 = vmatpush3.bf16.msra.mxu1 %v1710_v0  ;;  %1590 = vmatprep.mubr.msk.bf16.mxu1 %vm268_vm0, %v765_v7  ;;  %v1066_v46 = vsel %vm439_vm2, %v758_v6, %v1065_v42  ;;  %v973_v48 = vpack.c.bf16 %v967_v44, %v964_v43  ;;  %p1738_p0 = pnand %p1737_p13, %p1914_p3  ;;  %p1745_p5 = por %p1744_p4, %p1743_p2 }
  0x32   : > { %1583 = vmatmul.mubr.msk.bf16.vlgmr.msra.gmra.mxu0 %vm268_vm0, %v664_v11  ;;  %1588 = vmatprep.subr.bf16.mxu1 %v1711_v12  ;;  %v1069_v47 = vsel %vm439_vm2, %v1067_v40, %v1068_v21 }
  0x33   : > { %1595 = vmatpush3.bf16.msra.mxu0 %v1712_v8  ;;  %1598 = vmatprep.mubr.msk.bf16.mxu0 %vm268_vm0, %v1979_v16  ;;  %v863_v16 = vpack.c.bf16 %v1465_v32, %v2023_v45  ;;  %v1075_v49 = vpack.c.bf16 %v1069_v47, %v1066_v46  ;;  %v1719_v45 = vld [vmem:[%s2246_s3] sm:$0xff]   ;;  %p1739_p1 = pneg %p1738_p0 }
  0x34   : > { %1596 = vmatprep.subr.bf16.mxu0 %v1713_v15 }
  0x35   : > { %1589 = vmatpush3.bf16.msra.mxu1 %v1711_v12  ;;  %p1746_p6 = pnand %p1745_p5, %p1739_p1 }
  0x36   : > { %1602 = vmatprep.subr.bf16.mxu1 %v1714_v28 }
  0x37   : > { %1597 = vmatpush3.bf16.msra.mxu0 %v1713_v15 }
  0x38   : > { %1591 = vmatmul.mubr.msk.bf16.vlgmr.msra.gmra.mxu1 %vm268_vm0, %v766_v33  ;;  %1610 = vmatprep.subr.bf16.mxu0 %v1716_v34 }
  0x39   : > { %1603 = vmatpush3.bf16.msra.mxu1 %v1714_v28  ;;  %1606 = vmatprep.mubr.msk.bf16.mxu1 %vm268_vm0, %v972_v36 }
  0x3a   : > { %1599 = vmatmul.mubr.msk.bf16.vlgmr.msra.gmra.mxu0 %vm268_vm0, %v863_v16  ;;  %1604 = vmatprep.subr.bf16.mxu1 %v1715_v39 }
  0x3b   : > { %1611 = vmatpush3.bf16.msra.mxu0 %v1716_v34  ;;  %1614 = vmatprep.mubr.msk.bf16.mxu0 %vm268_vm0, %v1074_v41 }
  0x3c   : > { %1612 = vmatprep.subr.bf16.mxu0 %v1717_v22 }
  0x3d   : > { %1605 = vmatpush3.bf16.msra.mxu1 %v1715_v39 }
  0x3e   : > { %1618 = vmatprep.subr.bf16.mxu1 %v1718_v50 }
  0x3f   : > { %1613 = vmatpush3.bf16.msra.mxu0 %v1717_v22 }
  0x40   : > { %1607 = vmatmul.mubr.msk.bf16.vlgmr.msra.gmra.mxu1 %vm268_vm0, %v973_v48 }
  0x41   : > { %1619 = vmatpush3.bf16.msra.mxu1 %v1718_v50 }
  0x42   : > { %1615 = vmatmul.mubr.msk.bf16.vlgmr.msra.gmra.mxu0 %vm268_vm0, %v1075_v49  ;;  %1620 = vmatprep.subr.bf16.mxu1 %v1719_v45 }
  0x45   : > { %1621 = vmatpush3.bf16.msra.mxu1 %v1719_v45 }
  0xe2   : > { %v1552_v51 = vpop.f32.mrf.mxu0 }
  0xe3   : > { %326 = vst.msk [vmem:[#allocation2 + $0x10] sm:$0xff] %vm268_vm0, %v1552_v51 }
  0xe4   : > { %v309_v52 = vpop.f32.mrf.mxu0 }
  0xe5   : > { %324 = vst.msk [vmem:[#allocation2] sm:$0xff] %vm268_vm0, %v309_v52 }
  0xe6   : > { %v1553_v53 = vpop.f32.mrf.mxu0 }
  0xe7   : > { %327 = vst.msk [vmem:[#allocation2 + $0x18] sm:$0xff] %vm268_vm0, %v1553_v53 }
  0xe8   : > { %v1560_v54 = vpop.f32.mrf.mxu1  ;;  %v312_v55 = vpop.f32.mrf.mxu0 }
  0xe9   : > { %325 = vst.msk [vmem:[#allocation2 + $0x8] sm:$0xff] %vm268_vm0, %v312_v55 }
  0xea   : > { %v429_v56 = vld [vmem:[#allocation2 + $0x10] sm:$0xff]  ;;  %v412_v57 = vpop.f32.mrf.mxu1  ;;  %v1568_v63 = vpop.f32.mrf.mxu0 }
  0xeb   : > { %v433_v58 = vadd.f32 %v1560_v54, %v429_v56 }
  0xec   : > { %v427_v59 = vld [vmem:[#allocation2] sm:$0xff]  ;;  %v1561_v60 = vpop.f32.mrf.mxu1  ;;  %v515_v4 = vpop.f32.mrf.mxu0 }
  0xed   : > { %437 = vst.msk [vmem:[#allocation2 + $0x10] sm:$0xff] %vm268_vm0, %v433_v58  ;;  %v431_v61 = vadd.f32 %v427_v59, %v412_v57 }
  0xee   : > { %v430_v62 = vld [vmem:[#allocation2 + $0x18] sm:$0xff]  ;;  %v415_v1 = vpop.f32.mrf.mxu1  ;;  %v1569_v7 = vpop.f32.mrf.mxu0 }
  0xef   : > { %435 = vst.msk [vmem:[#allocation2] sm:$0xff] %vm268_vm0, %v431_v61  ;;  %v434_v0 = vadd.f32 %v1561_v60, %v430_v62 }
  0xf0   : > { %v428_v2 = vld [vmem:[#allocation2 + $0x8] sm:$0xff]  ;;  %v1576_v11 = vpop.f32.mrf.mxu1  ;;  %v518_v13 = vpop.f32.mrf.mxu0 }
  0xf1   : > { %438 = vst.msk [vmem:[#allocation2 + $0x18] sm:$0xff] %vm268_vm0, %v434_v0  ;;  %v432_v3 = vadd.f32 %v428_v2, %v415_v1 }
  0xf2   : > { %v612_v19 = vpop.f32.mrf.mxu1  ;;  %v1584_v28 = vpop.f32.mrf.mxu0 }
  0xf3   : > { %436 = vst.msk [vmem:[#allocation2 + $0x8] sm:$0xff] %vm268_vm0, %v432_v3 }
  0xf4   : > { %v532_v5 = vld [vmem:[#allocation2 + $0x10] sm:$0xff]  ;;  %v1577_v25 = vpop.f32.mrf.mxu1  ;;  %v722_v33 = vpop.f32.mrf.mxu0 }
  0xf5   : > { %v536_v6 = vadd.f32 %v1568_v63, %v532_v5 }
  0xf6   : > { %v530_v8 = vld [vmem:[#allocation2] sm:$0xff]  ;;  %v615_v30 = vpop.f32.mrf.mxu1  ;;  %v1585_v18 = vpop.f32.mrf.mxu0 }
  0xf7   : > { %540 = vst.msk [vmem:[#allocation2 + $0x10] sm:$0xff] %vm268_vm0, %v536_v6  ;;  %v534_v9 = vadd.f32 %v530_v8, %v515_v4 }
  0xf8   : > { %v533_v10 = vld [vmem:[#allocation2 + $0x18] sm:$0xff]  ;;  %v1592_v38 = vpop.f32.mrf.mxu1  ;;  %v725_v39 = vpop.f32.mrf.mxu0 }
  0xf9   : > { %538 = vst.msk [vmem:[#allocation2] sm:$0xff] %vm268_vm0, %v534_v9  ;;  %v537_v12 = vadd.f32 %v1569_v7, %v533_v10 }
  0xfa   : > { %v531_v14 = vld [vmem:[#allocation2 + $0x8] sm:$0xff]  ;;  %v824_v42 = vpop.f32.mrf.mxu1  ;;  %v1600_v48 = vpop.f32.mrf.mxu0 }
  0xfb   : > { %541 = vst.msk [vmem:[#allocation2 + $0x18] sm:$0xff] %vm268_vm0, %v537_v12  ;;  %v535_v15 = vadd.f32 %v531_v14, %v518_v13 }
  0xfc   : > { %v1593_v44 = vpop.f32.mrf.mxu1  ;;  %v921_v52 = vpop.f32.mrf.mxu0 }
  0xfd   : > { %539 = vst.msk [vmem:[#allocation2 + $0x8] sm:$0xff] %vm268_vm0, %v535_v15 }
  0xfe   : > { %v629_v20 = vld [vmem:[#allocation2 + $0x10] sm:$0xff]  ;;  %v827_v50 = vpop.f32.mrf.mxu1  ;;  %v1601_v56 = vpop.f32.mrf.mxu0 }
  0xff   : > { %v633_v23 = vadd.f32 %v1576_v11, %v629_v20 }
 0x100   : > { %v627_v24 = vld [vmem:[#allocation2] sm:$0xff]  ;;  %v1608_v59 = vpop.f32.mrf.mxu1  ;;  %v924_v61 = vpop.f32.mrf.mxu0 }
 0x101   : > { %637 = vst.msk [vmem:[#allocation2 + $0x10] sm:$0xff] %vm268_vm0, %v633_v23  ;;  %v631_v26 = vadd.f32 %v627_v24, %v612_v19 }
 0x102   : > { %v630_v27 = vld [vmem:[#allocation2 + $0x18] sm:$0xff]  ;;  %v1031_v0 = vpop.f32.mrf.mxu1  ;;  %v1616_v8 = vpop.f32.mrf.mxu0 }
 0x103   : > { %635 = vst.msk [vmem:[#allocation2] sm:$0xff] %vm268_vm0, %v631_v26  ;;  %v634_v29 = vadd.f32 %v1577_v25, %v630_v27 }
 0x104   : > { %v628_v31 = vld [vmem:[#allocation2 + $0x8] sm:$0xff]  ;;  %v1609_v4 = vpop.f32.mrf.mxu1  ;;  %v1133_v12 = vpop.f32.mrf.mxu0 }
 0x105   : > { %638 = vst.msk [vmem:[#allocation2 + $0x18] sm:$0xff] %vm268_vm0, %v634_v29  ;;  %v632_v32 = vadd.f32 %v628_v31, %v615_v30  ;;  %v1491_v29 = vld [vmem:[%s2245_s2] ss:$0 sm:$0xff] }
 0x106   : > { %v1034_v9 = vpop.f32.mrf.mxu1  ;;  %v1617_v19 = vpop.f32.mrf.mxu0 }
 0x107   : > { %636 = vst.msk [vmem:[#allocation2 + $0x8] sm:$0xff] %vm268_vm0, %v632_v32 }
 0x108   : > { %v739_v34 = vld [vmem:[#allocation2 + $0x10] sm:$0xff]  ;;  %v1136_v25 = vpop.f32.mrf.mxu0 }
 0x109   : > { %v743_v35 = vadd.f32 %v1584_v28, %v739_v34 }
 0x10a   : > { %v737_v17 = vld [vmem:[#allocation2] sm:$0xff] }
 0x10b   : > { %747 = vst.msk [vmem:[#allocation2 + $0x10] sm:$0xff] %vm268_vm0, %v743_v35  ;;  %v741_v36 = vadd.f32 %v737_v17, %v722_v33 }
 0x10c   : > { %v740_v37 = vld [vmem:[#allocation2 + $0x18] sm:$0xff] }
 0x10d   : > { %745 = vst.msk [vmem:[#allocation2] sm:$0xff] %vm268_vm0, %v741_v36  ;;  %v744_v16 = vadd.f32 %v1585_v18, %v740_v37 }
 0x10e   : > { %v738_v40 = vld [vmem:[#allocation2 + $0x8] sm:$0xff] }
 0x10f   : > { %748 = vst.msk [vmem:[#allocation2 + $0x18] sm:$0xff] %vm268_vm0, %v744_v16  ;;  %v742_v41 = vadd.f32 %v738_v40, %v725_v39  ;;  %v1492_v40 = vld [vmem:[%s2247_s4] ss:$0 sm:$0xff] }
 0x111   : > { %746 = vst.msk [vmem:[#allocation2 + $0x8] sm:$0xff] %vm268_vm0, %v742_v41 }
 0x112   : > { %v841_v21 = vld [vmem:[#allocation2 + $0x10] sm:$0xff] }
 0x113   : > { %v845_v22 = vadd.f32 %v1592_v38, %v841_v21 }
 0x114   : > { %v839_v43 = vld [vmem:[#allocation2] sm:$0xff] }
 0x115   : > { %849 = vst.msk [vmem:[#allocation2 + $0x10] sm:$0xff] %vm268_vm0, %v845_v22  ;;  %v843_v46 = vadd.f32 %v839_v43, %v824_v42 }
 0x116   : > { %v842_v47 = vld [vmem:[#allocation2 + $0x18] sm:$0xff] }
 0x117   : > { %847 = vst.msk [vmem:[#allocation2] sm:$0xff] %vm268_vm0, %v843_v46  ;;  %v846_v49 = vadd.f32 %v1593_v44, %v842_v47 }
 0x118   : > { %v840_v45 = vld [vmem:[#allocation2 + $0x8] sm:$0xff] }
 0x119   : > { %850 = vst.msk [vmem:[#allocation2 + $0x18] sm:$0xff] %vm268_vm0, %v846_v49  ;;  %v844_v51 = vadd.f32 %v840_v45, %v827_v50 }
 0x11b   : > { %848 = vst.msk [vmem:[#allocation2 + $0x8] sm:$0xff] %vm268_vm0, %v844_v51 }
 0x11c   : > { %v938_v53 = vld [vmem:[#allocation2 + $0x10] sm:$0xff] }
 0x11d   : > { %v942_v54 = vadd.f32 %v1600_v48, %v938_v53 }
 0x11e   : > { %v936_v55 = vld [vmem:[#allocation2] sm:$0xff] }
 0x11f   : > { %946 = vst.msk [vmem:[#allocation2 + $0x10] sm:$0xff] %vm268_vm0, %v942_v54  ;;  %v940_v57 = vadd.f32 %v936_v55, %v921_v52 }
 0x120   : > { %v939_v58 = vld [vmem:[#allocation2 + $0x18] sm:$0xff] }
 0x121   : > { %944 = vst.msk [vmem:[#allocation2] sm:$0xff] %vm268_vm0, %v940_v57  ;;  %v943_v60 = vadd.f32 %v1601_v56, %v939_v58  ;;  %v1259_v58 = vlaneseq }
 0x122   : > { %v937_v62 = vld [vmem:[#allocation2 + $0x8] sm:$0xff] }
 0x123   : > { %947 = vst.msk [vmem:[#allocation2 + $0x18] sm:$0xff] %vm268_vm0, %v943_v60  ;;  %v941_v63 = vadd.f32 %v937_v62, %v924_v61 }
 0x125   : > { %945 = vst.msk [vmem:[#allocation2 + $0x8] sm:$0xff] %vm268_vm0, %v941_v63  ;;  %v1260_v63 = vand.u32 127, %v1259_v58 }
 0x126   : > { %v1048_v1 = vld [vmem:[#allocation2 + $0x10] sm:$0xff] }
 0x127   : > { %v1052_v2 = vadd.f32 %v1608_v59, %v1048_v1  ;;  %vm1281_vm3 = vcmp.ge.s32.totalorder %v1260_v63, 54  ;;  %vm1282_vm4 = vcmp.lt.s32.totalorder %v1260_v63, 63 }
 0x128   : > { %v1046_v3 = vld [vmem:[#allocation2] sm:$0xff]  ;;  %vm2173_vm5 = vmand %vm1281_vm3, %vm1282_vm4 }
 0x129   : > { %1056 = vst.msk [vmem:[#allocation2 + $0x10] sm:$0xff] %vm268_vm0, %v1052_v2  ;;  %v1050_v5 = vadd.f32 %v1046_v3, %v1031_v0 }
 0x12a   : > { %v1049_v6 = vld [vmem:[#allocation2 + $0x18] sm:$0xff] }
 0x12b   : > { %1054 = vst.msk [vmem:[#allocation2] sm:$0xff] %vm268_vm0, %v1050_v5  ;;  %v1053_v7 = vadd.f32 %v1609_v4, %v1049_v6 }
 0x12c   : > { %v1047_v10 = vld [vmem:[#allocation2 + $0x8] sm:$0xff] }
 0x12d   : > { %1057 = vst.msk [vmem:[#allocation2 + $0x18] sm:$0xff] %vm268_vm0, %v1053_v7  ;;  %v1051_v11 = vadd.f32 %v1047_v10, %v1034_v9 }
 0x12f   : > { %1055 = vst.msk [vmem:[#allocation2 + $0x8] sm:$0xff] %vm268_vm0, %v1051_v11 }
 0x130   : > { %v1150_v13 = vld [vmem:[#allocation2 + $0x10] sm:$0xff] }
 0x131   : > { %v1154_v14 = vadd.f32 %v1616_v8, %v1150_v13 }
 0x132   : > { %v1148_v15 = vld [vmem:[#allocation2] sm:$0xff] }
 0x133   : > { %1158 = vst.msk [vmem:[#allocation2 + $0x10] sm:$0xff] %vm268_vm0, %v1154_v14  ;;  %v1152_v20 = vadd.f32 %v1148_v15, %v1133_v12 }
 0x134   : > { %v1151_v23 = vld [vmem:[#allocation2 + $0x18] sm:$0xff] }
 0x135   : > { %1156 = vst.msk [vmem:[#allocation2] sm:$0xff] %vm268_vm0, %v1152_v20  ;;  %v1155_v24 = vadd.f32 %v1617_v19, %v1151_v23 }
 0x136   : > { %v1149_v26 = vld [vmem:[#allocation2 + $0x8] sm:$0xff] }
 0x137   : > { %1159 = vst.msk [vmem:[#allocation2 + $0x18] sm:$0xff] %vm268_vm0, %v1155_v24  ;;  %v1153_v27 = vadd.f32 %v1149_v26, %v1136_v25 }
 0x139   : > { %1157 = vst.msk [vmem:[#allocation2 + $0x8] sm:$0xff] %vm268_vm0, %v1153_v27 }
 0x13a   : > { %v1162_v30 = vld [vmem:[#allocation2 + $0x10] sm:$0xff] }
 0x13b   : > { %v1173_v35 = vadd.f32 %v1491_v29, %v1162_v30 }
 0x13c   : > { %v1160_v28 = vld [vmem:[#allocation2] sm:$0xff] }
 0x13d   : > { %v1171_v32 = vadd.f32 %v1491_v29, %v1160_v28  ;;  %v1177_v38 = vmax.f32 %v1173_v35, 0.0 }
 0x13e   : > { %v1163_v31 = vld [vmem:[#allocation2 + $0x18] sm:$0xff] }
 0x13f   : > { %v1174_v33 = vadd.f32 %v1491_v29, %v1163_v31  ;;  %v1175_v36 = vmax.f32 %v1171_v32, 0.0 }
 0x140   : > { %v1161_v34 = vld [vmem:[#allocation2 + $0x8] sm:$0xff] }
 0x141   : > { %v1172_v17 = vadd.f32 %v1491_v29, %v1161_v34  ;;  %v1178_v18 = vmax.f32 %v1174_v33, 0.0 }
 0x143   : > { %v1176_v37 = vmax.f32 %v1172_v17, 0.0  ;;  %v1180_v39 = vpack.c.bf16 %v1178_v18, %v1177_v38 }
 0x145   : > { %v1179_v16 = vpack.c.bf16 %v1176_v37, %v1175_v36 }
 0x147   : > { %1622 = vmatprep.mubr.msk.bf16.mxu1 %vm268_vm0, %v1179_v16 }
 0x148   : > { %1623 = vmatmul.mubr.msk.bf16.vlgmr.msra.gmra.mxu1 %vm268_vm0, %v1180_v39 }
 0x208   : > { %v1624_v41 = vpop.f32.mrf.mxu1 }
 0x209   : > { %v1253_v42 = vadd.f32 %v1624_v41, %v1492_v40 }
 0x20a   : > { %v1244_v21 = vpop.f32.mrf.mxu1 }
 0x20b   : > { %v1263_v22 = vsub.f32 0.0, %v1253_v42  ;;  %v1245_v43 = vadd.f32 %v1492_v40, %v1244_v21 }
 0x20c   : > { %v1625_v44 = vpop.f32.mrf.mxu1 }
 0x20d   : > { %v1269_v46 = vmul.f32 1.442695, %v1263_v22  ;;  %v1261_v47 = vsub.f32 0.0, %v1245_v43  ;;  %v1256_v48 = vadd.f32 %v1625_v44, %v1492_v40 }
 0x20e   : > { %v1247_v49 = vpop.f32.mrf.mxu1 }
 0x20f   : > { %1720 = vpow2.f32 %v1269_v46  ;;  %v1265_v50 = vmul.f32 1.442695, %v1261_v47  ;;  %v1264_v45 = vsub.f32 0.0, %v1256_v48  ;;  %v1248_v51 = vadd.f32 %v1492_v40, %v1247_v49 }
 0x211   : > { %1722 = vpow2.f32 %v1265_v50  ;;  %v1271_v52 = vmul.f32 1.442695, %v1264_v45  ;;  %v1262_v53 = vsub.f32 0.0, %v1248_v51 }
 0x213   : > { %1724 = vpow2.f32 %v1271_v52  ;;  %v1267_v54 = vmul.f32 1.442695, %v1262_v53 }
 0x215   : > { %1726 = vpow2.f32 %v1267_v54 }
 0x21c   : > { %v1721_v55 = vpop.eup %1720 }
 0x21d   : > { %v1275_v56 = vadd.f32 1.0, %v1721_v55 }
 0x21e   : > { %v1723_v57 = vpop.eup %1722 }
 0x21f   : > { %1728 = vrcp.f32 %v1275_v56  ;;  %v1273_v59 = vadd.f32 1.0, %v1723_v57 }
 0x220   : > { %v1725_v60 = vpop.eup %1724 }
 0x221   : > { %1730 = vrcp.f32 %v1273_v59  ;;  %v1276_v61 = vadd.f32 1.0, %v1725_v60 }
 0x222   : > { %v1727_v62 = vpop.eup %1726 }
 0x223   : > { %1732 = vrcp.f32 %v1276_v61  ;;  %v1274_v0 = vadd.f32 1.0, %v1727_v62 }
 0x225   : > { %1734 = vrcp.f32 %v1274_v0 }
 0x22c   : > { %v1729_v2 = vpop.eup %1728 }
 0x22d   : > { %v1286_v3 = vsel %vm2173_vm5, %v1729_v2, %v1253_v42 }
 0x22e   : > { %v1731_v4 = vpop.eup %1730  ;;  %1290 = vst [vmem:[%s231_s17 + $0x10] sm:$0xff] %v1286_v3 }
 0x22f   : > { %v1284_v5 = vsel %vm2173_vm5, %v1731_v4, %v1245_v43 }
 0x230   : > { %v1733_v6 = vpop.eup %1732  ;;  %1288 = vst [vmem:[%s231_s17] sm:$0xff] %v1284_v5 }
 0x231   : > { %v1287_v8 = vsel %vm2173_vm5, %v1733_v6, %v1256_v48 }
 0x232   : > { %v1735_v7 = vpop.eup %1734  ;;  %1291 = vst [vmem:[%s231_s17 + $0x18] sm:$0xff] %v1287_v8 }
 0x233   : > { %v1285_v9 = vsel %vm2173_vm5, %v1735_v7, %v1248_v51 }
 0x234   : > { %1289 = vst [vmem:[%s231_s17 + $0x8] sm:$0xff] %v1285_v9 }
 0x235   : > { %1749 = shalt.err (!%p1746_p6)
}
 0x236   : > { %s1750_s12 = scalar_lea.hbm %s2188_s27, 512  ;;  %s1754_s15 = scalar_lea.hbm %s2248_s5, 2048 }
 0x237   : > { %p1751_p7 = scmp.ne.s32.totalorder %s2188_s27, %s1750_s12  ;;  %p1755_p11 = scmp.lt.s32.totalorder %s2188_s27, %s2248_s5 }
 0x238   : > { %p1756_p12 = scmp.lt.s32.totalorder %s1754_s15, %s1750_s12 }
 0x239   : > { %p1752_p9 = pnand %p1751_p7, %p1914_p3 }
 0x23a   : > { %p1757_p13 = por %p1756_p12, %p1755_p11 }
 0x23b   : > { %p1753_p10 = pneg %p1752_p9 }
 0x23d   : > { %p1758_p0 = pnand %p1757_p13, %p1753_p10 }
 0x23f   : > { %1761 = shalt.err (!%p1758_p0)
}
 0x240   : > { %s1831_s21 = smov 128   ;;  %s1832_s22 = smov 8  }
 0x241   : > { %1627 = dma.vmem_to_hbm [thread:$0]  (%p1914_p3), %s2181_s29, 512, %s2188_s27, %s2192_s30, %s1831_s21, %s1831_s21, %s1832_s22  }
 0x242 PF: > { %p1633_p1 = scmp.ge.s32.totalorder %s1828_s25, 2  ;;  %s1323_s8 = sand.u32 1, %s1800_s18  }
 0x243   : > { %s1324_s9 = scalar_lea.sflag [#allocation4], %s1323_s8 }
 0x244   : > { %p1630_p2 = pnand %p1633_p1, %p1923_p8 }
 0x246   : > { %p1631_p4 = pneg %p1630_p2 }
 0x248   : > { %1795 = dma.done.wait (%p1631_p4), %s1324_s9, 512  }
 0x249   : > { %1797 = vsyncadd (%p1631_p4), %s1324_s9, 4294966784  ;;  %s18_s25 = sadd.s32 1, %s1828_s25   ;;  %s2255_s6 = sld [smem:[#allocation6_spill]] }
 0x24a   : > { %p15_p5 = scmp.ge.s32.totalorder %s18_s25, 6   ;;  %s2256_s18 = smov %s1804_s19 }
 0x24b   : > { %s2257_s19 = smov %s1808_s20  ;;  %s2258_s20 = smov %s1932_s11 }
 0x24c   : > { %s2259_s21 = smov %s1820_s23  ;;  %s2260_s22 = smov %s1824_s24 }
 0x24d   : > { %s2261_s23 = smov %s2264_s28  ;;  %17 = sbr.rel (!%p15_p5) target bundleno = 5 (0x5), region = 86 }
 0x24f   : > { %s2262_s24 = smov %s2255_s6 }
 0x252   :  { %1329 = vsyncpa [#allocation4], 1 }
 0x253   :  { %1331 = vsyncpa [#allocation4 + $0x1], 1 }

// kernel: tpu_custom_call.1
= control target key start
LH: loop header
LB: loop body
LE: loop exit
PB: predicated region body
PF: predicated region fallthrough
CT: control target
= control target key end

     0   :  { %10 = vsyncpa [#allocation4], 0  ;;  %s2243_s0 = inlined_call_operand.vmem [shape: f32[2,10,10,32], index: 0, kind: input, shape index: {}]   ;;  %s2244_s1 = inlined_call_operand.vmem [shape: bf16[9,32,32], index: 1, kind: input, shape index: {}]   ;;  %s2245_s2 = inlined_call_operand.vmem [shape: f32[1,32], index: 2, kind: input, shape index: {}]   ;;  %s2246_s3 = inlined_call_operand.vmem [shape: bf16[32,128], index: 3, kind: input, shape index: {}]   ;;  %s2247_s4 = inlined_call_operand.vmem [shape: f32[1,128], index: 4, kind: input, shape index: {}]   ;;  %s2248_s5 = inlined_call_operand.hbm [shape: f32[2,64,128], index: 5, kind: output, shape index: {}]  }
   0x1   :  { %12 = vsyncpa [#allocation4 + $0x1], 0  ;;  %s1863_s18 = smov 0   ;;  %s1865_s19 = smov 0  }
   0x2   :  { %s1867_s20 = smov 0   ;;  %s1869_s21 = smov 0  }
   0x3   :  { %s1871_s22 = smov 0   ;;  %s1873_s23 = smov 0  }
   0x4   :  { %s1875_s24 = smov 0   ;;  %s1877_s25 = smov 0  }
   0x5 LB: > { %s1394_s26 = sadd.s32 4294967295, %s1828_s25   ;;  %s1395_s27 = sadd.s32 4294967294, %s1828_s25   ;;  %s1828_s25 = sphi %s1877_s25, %s18_s25   ;;  %s1824_s24 = sphi %s1875_s24, %s2262_s24   ;;  %s1820_s23 = sphi %s1873_s23, %s2261_s23   ;;  %s1816_s22 = sphi %s1871_s22, %s2260_s22   ;;  %s1812_s21 = sphi %s1869_s21, %s2259_s21   ;;  %s1808_s20 = sphi %s1867_s20, %s2258_s20   ;;  %s1804_s19 = sphi %s1865_s19, %s2257_s19   ;;  %s1800_s18 = sphi %s1863_s18, %s2256_s18  }
   0x6   : > { %s27_s28 = sadd.s32 1, %s1820_s23  ;;  %s30_s29 = sadd.s32 1, %s1824_s24 }
   0x7   : > { %p28_p0 = scmp.ge.s32.totalorder %s27_s28, 2  ;;  %p159_p1 = scmp.ne.s32.totalorder %s1808_s20, %s1804_s19 }
   0x8   : > { %p160_p2 = scmp.eq.s32.totalorder %s1394_s26, 3  ;;  %p165_p5 = scmp.ne.s32.totalorder %s1804_s19, %s1800_s18 }
   0x9   : > { %s2264_s28 = smov (%p28_p0, %s27_s28), 0  ;;  %s2266_s29 = smov (!%p28_p0, %s30_s29), %s1824_s24 }
   0xa   : > { %s145_s30 = ssub.s32 %s1820_s23, %s2264_s28  ;;  %p1914_p3 = por %p160_p2, %p159_p1 }
   0xb   : > { %p32_p4 = scmp.ge.s32.totalorder %s2266_s29, 2  ;;  %p166_p6 = scmp.eq.s32.totalorder %s1395_s27, 3 }
   0xc   : > { %p1398_p7 = scmp.ge.s32.totalorder %s1828_s25, 1  ;;  %p204_p9 = scmp.lt.s32.totalorder %s1828_s25, 5 }
   0xd   : > { %s2268_s29 = smov (%p32_p4, %s2266_s29), 0  ;;  %p1923_p8 = por %p166_p6, %p165_p5 }
   0xe   : > { %2251 = sst [smem:[#allocation6_spill]] %s2268_s29  ;;  %s144_s8 = ssub.s32 %s1824_s24, %s2268_s29 }
   0xf   : > { %s149_s9 = sadd.s32 1, %s1808_s20  ;;  %s146_s10 = sor.u32 %s145_s30, %s144_s8 }
  0x10   : > { %p205_p10 = pnand %p1398_p7, %p204_p9  ;;  %p147_p11 = scmp.eq.s32.totalorder %s146_s10, 0 }
  0x11   : > { %p232_p12 = scmp.lt.s32.totalorder (!%p205_p10), %s1816_s22, 1  ;;  %s229_s12 = sand.u32 (!%p205_p10), 1, %s1804_s19  }
  0x12   : > { %s1932_s11 = scalar_select %p147_p11, %s1808_s20, %s149_s9  }
  0x13   : > { %208 = sbr.rel (%p205_p10) target bundleno = 578 (0x242), region = 40  ;;  %s1503_s9 = sshll.u32 (!%p205_p10), %s1812_s21, 6 }
  0x14   : > { %s1498_s13 = sshll.u32 (!%p205_p10), %s1812_s21, 2  ;;  %s1499_s14 = sshll.u32 (!%p205_p10), %s1816_s22, 3 }
  0x15   : > { %s2192_s30 = scalar_lea.sflag (!%p205_p10), [#allocation4], %s229_s12 }
  0x18   : > { %v1700_v0 = vld [vmem:[%s2244_s1 + $0x8] sm:$0xff]   ;;  %v1701_v1 = vld [vmem:[%s2244_s1 + $0x18] sm:$0xff]   ;;  %v1702_v2 = vld [vmem:[%s2244_s1] sm:$0xff]   ;;  %s233_s26 = scalar_select %p232_p12, %s1816_s22, 1  ;;  %vm268_vm0 = vcmask 261120   ;;  %vm336_vm1 = vcmask 1046528  }
  0x19   : > { %1546 = vmatprep.subr.bf16.mxu0 %v1700_v0  ;;  %1554 = vmatprep.subr.bf16.mxu1 %v1701_v1  ;;  %v1703_v3 = vld [vmem:[%s2244_s1 + $0x10] sm:$0xff]   ;;  %v1704_v4 = vld [vmem:[%s2244_s1 + $0x28] sm:$0xff]   ;;  %v1960_v5 = vld [vmem:[%s2244_s1 + $0x38] sm:$0xff]   ;;  %vm439_vm2 = vcmask 1045504  }
  0x1a   : > { %1547 = vmatpush3.bf16.msra.mxu0 %v1700_v0  ;;  %1555 = vmatpush3.bf16.msra.mxu1 %v1701_v1  ;;  %s1626_s8 = smul.u32 160, %s233_s26  ;;  %v1705_v20 = vld [vmem:[%s2244_s1 + $0x20] sm:$0xff]   ;;  %v1708_v35 = vld [vmem:[%s2244_s1 + $0x48] sm:$0xff]   ;;  %v1707_v40 = vld [vmem:[%s2244_s1 + $0x30] sm:$0xff]  }
  0x1b   : > { %1548 = vmatprep.subr.bf16.mxu0 %v1702_v2  ;;  %1556 = vmatprep.subr.bf16.mxu1 %v1703_v3  ;;  %v1709_v56 = vld [vmem:[%s2244_s1 + $0x40] sm:$0xff]   ;;  %v1710_v0 = vld [vmem:[%s2244_s1 + $0x58] sm:$0xff]  }
  0x1c   : > { %s236_s15 = scalar_lea.vmem %s2243_s0, %s1626_s8 }
  0x1d   : > { %s1955_s16 = scalar_lea.vmem %s236_s15, %s1503_s9  ;;  %s1305_s15 = sadd.s32 %s1499_s14, %s1498_s13 }
  0x1e   : > { %1549 = vmatpush3.bf16.msra.mxu0 %v1702_v2  ;;  %v242_v6 = vld [vmem:[%s1955_s16] sm:$0xff]  ;;  %v1964_v7 = vld [vmem:[%s1955_s16 + $0x10] sm:$0xff]  ;;  %1557 = vmatpush3.bf16.msra.mxu1 %v1703_v3  ;;  %v243_v14 = vld [vmem:[%s1955_s16 + $0x8] sm:$0x3]  ;;  %s1500_s26 = sshll.u32 %s1305_s15, 7  ;;  %s1830_s9 = smov [#allocation3]  }
  0x1f   : > { %v1967_v8 = vld [vmem:[%s1955_s16 + $0x20] sm:$0xff]  ;;  %1562 = vmatprep.subr.bf16.mxu0 %v1704_v4  ;;  %v250_v9 = vpack.c.bf16 %v1964_v7, %v242_v6  ;;  %v337_v10 = vrot.slane %v242_v6, 1  ;;  %v340_v11 = vrot.slane %v1964_v7, 1  ;;  %v440_v12 = vrot.slane %v242_v6, 2  ;;  %v1972_v13 = vld [vmem:[%s1955_s16 + $0x30] sm:$0xff]  ;;  %1570 = vmatprep.subr.bf16.mxu1 %v1960_v5  ;;  %s2188_s27 = scalar_lea.hbm %s2248_s5, %s1500_s26  ;;  %s1740_s10 = sshll.u32 %s1830_s9, 4  ;;  %s1741_s10 = int_to_ptr.vmem [resolvable:$false] %s1740_s10 }
  0x20   : > { %v443_v15 = vrot.slane %v1964_v7, 2  ;;  %v1979_v16 = vpack.c.bf16 %v1972_v13, %v1967_v8  ;;  %v1982_v17 = vrot.slane %v1967_v8, 1  ;;  %v1985_v18 = vrot.slane %v1972_v13, 1  ;;  %v245_v19 = vld [vmem:[%s1955_s16 + $0x18] sm:$0x3]  ;;  %v2023_v45 = vld [vmem:[%s1955_s16 + $0x40] sm:$0xff] }
  0x21   : > { %1550 = vmatprep.mubr.msk.bf16.mxu0 %vm268_vm0, %v250_v9  ;;  %v1993_v21 = vrot.slane %v1967_v8, 2  ;;  %v1996_v22 = vrot.slane %v1972_v13, 2  ;;  %v338_v23 = vrot.slane %v243_v14, 1  ;;  %v341_v24 = vrot.slane %v245_v19, 1  ;;  %v247_v25 = vld [vmem:[%s1955_s16 + $0x28] sm:$0x3] }
  0x22   : > { %1551 = vmatmul.mubr.msk.bf16.vlgmr.msra.gmra.mxu0 %vm268_vm0, %v1979_v16  ;;  %v441_v26 = vrot.slane %v243_v14, 2  ;;  %v444_v27 = vrot.slane %v245_v19, 2  ;;  %v249_v28 = vld [vmem:[%s1955_s16 + $0x38] sm:$0x3]  ;;  %v344_v29 = vrot.slane %v247_v25, 1  ;;  %v447_v30 = vrot.slane %v247_v25, 2 }
  0x23   : > { %v339_v31 = vsel %vm336_vm1, %v337_v10, %v338_v23  ;;  %v342_v32 = vsel %vm336_vm1, %v340_v11, %v341_v24  ;;  %v347_v33 = vrot.slane %v249_v28, 1  ;;  %v450_v34 = vrot.slane %v249_v28, 2  ;;  %1563 = vmatpush3.bf16.msra.mxu0 %v1704_v4  ;;  %v1426_v46 = vld [vmem:[%s1955_s16 + $0x18] sm:$0x3]  ;;  %v1428_v47 = vld [vmem:[%s1955_s16 + $0x28] sm:$0x3] }
  0x24   : > { %v353_v36 = vpack.c.bf16 %v342_v32, %v339_v31  ;;  %v345_v37 = vsel %vm336_vm1, %v1982_v17, %v344_v29  ;;  %1564 = vmatprep.subr.bf16.mxu0 %v1705_v20  ;;  %v442_v38 = vsel %vm439_vm2, %v440_v12, %v441_v26  ;;  %v445_v39 = vsel %vm439_vm2, %v443_v15, %v444_v27  ;;  %v1430_v51 = vld [vmem:[%s1955_s16 + $0x38] sm:$0x3]  ;;  %v1432_v52 = vld [vmem:[%s1955_s16 + $0x48] sm:$0x3]  ;;  %v1711_v12 = vld [vmem:[%s2244_s1 + $0x50] sm:$0xff]  }
  0x25   : > { %v348_v41 = vsel %vm336_vm1, %v1985_v18, %v347_v33  ;;  %v456_v42 = vpack.c.bf16 %v445_v39, %v442_v38  ;;  %v448_v43 = vsel %vm439_vm2, %v1993_v21, %v447_v30  ;;  %v451_v44 = vsel %vm439_vm2, %v1996_v22, %v450_v34  ;;  %v1462_v14 = vld [vmem:[%s1955_s16 + $0x38] sm:$0x3]  ;;  %v1464_v23 = vld [vmem:[%s1955_s16 + $0x48] sm:$0x3]  ;;  %v1465_v32 = vld [vmem:[%s1955_s16 + $0x50] sm:$0xff] }
  0x26   : > { %1558 = vmatprep.mubr.msk.bf16.mxu1 %vm268_vm0, %v353_v36  ;;  %v354_v48 = vpack.c.bf16 %v348_v41, %v345_v37  ;;  %v457_v49 = vpack.c.bf16 %v451_v44, %v448_v43  ;;  %v553_v50 = vpack.c.bf16 %v1967_v8, %v1964_v7  ;;  %v656_v53 = vrot.slane %v2023_v45, 1  ;;  %v1712_v8 = vld [vmem:[%s2244_s1 + $0x68] sm:$0xff]   ;;  %v1466_v24 = vld [vmem:[%s1955_s16 + $0x58] sm:$0x3]  ;;  %v1715_v39 = vld [vmem:[%s2244_s1 + $0x70] sm:$0xff]  }
  0x27   : > { %1565 = vmatpush3.bf16.msra.mxu0 %v1705_v20  ;;  %1566 = vmatprep.mubr.msk.bf16.mxu0 %vm268_vm0, %v456_v42  ;;  %v648_v54 = vrot.slane %v1426_v46, 1  ;;  %v651_v55 = vrot.slane %v1428_v47, 1  ;;  %v654_v57 = vrot.slane %v1430_v51, 1  ;;  %v657_v58 = vrot.slane %v1432_v52, 1  ;;  %v1714_v28 = vld [vmem:[%s2244_s1 + $0x78] sm:$0xff]   ;;  %v1716_v34 = vld [vmem:[%s2244_s1 + $0x88] sm:$0xff]  }
  0x28   : > { %1559 = vmatmul.mubr.msk.bf16.vlgmr.msra.gmra.mxu1 %vm268_vm0, %v354_v48  ;;  %1578 = vmatprep.subr.bf16.mxu0 %v1708_v35  ;;  %v750_v61 = vrot.slane %v1426_v46, 2  ;;  %v753_v62 = vrot.slane %v1428_v47, 2  ;;  %v758_v6 = vrot.slane %v2023_v45, 2  ;;  %v756_v9 = vrot.slane %v1430_v51, 2 }
  0x29   : > { %1571 = vmatpush3.bf16.msra.mxu1 %v1960_v5  ;;  %1574 = vmatprep.mubr.msk.bf16.mxu1 %vm268_vm0, %v553_v50  ;;  %v649_v59 = vsel %vm336_vm1, %v340_v11, %v648_v54  ;;  %v652_v60 = vsel %vm336_vm1, %v1982_v17, %v651_v55  ;;  %v655_v1 = vsel %vm336_vm1, %v1985_v18, %v654_v57  ;;  %v759_v10 = vrot.slane %v1432_v52, 2  ;;  %v1718_v50 = vld [vmem:[%s2246_s3 + $0x8] sm:$0xff]  }
  0x2a   : > { %1567 = vmatmul.mubr.msk.bf16.vlgmr.msra.gmra.mxu0 %vm268_vm0, %v457_v49  ;;  %1572 = vmatprep.subr.bf16.mxu1 %v1707_v40  ;;  %v663_v63 = vpack.c.bf16 %v652_v60, %v649_v59  ;;  %v658_v2 = vsel %vm336_vm1, %v656_v53, %v657_v58  ;;  %v751_v3 = vsel %vm439_vm2, %v443_v15, %v750_v61  ;;  %v1713_v15 = vld [vmem:[%s2244_s1 + $0x60] sm:$0xff]   ;;  %v960_v20 = vrot.slane %v1462_v14, 1 }
  0x2b   : > { %1579 = vmatpush3.bf16.msra.mxu0 %v1708_v35  ;;  %v754_v4 = vsel %vm439_vm2, %v1993_v21, %v753_v62  ;;  %v554_v5 = vpack.c.bf16 %v2023_v45, %v1972_v13  ;;  %v664_v11 = vpack.c.bf16 %v658_v2, %v655_v1  ;;  %v1460_v13 = vld [vmem:[%s1955_s16 + $0x28] sm:$0x3]  ;;  %v757_v25 = vsel %vm439_vm2, %v1996_v22, %v756_v9  ;;  %s1399_s16 = sshll.u32 %s229_s12, 5 }
  0x2c   : > { %1580 = vmatprep.subr.bf16.mxu0 %v1709_v56  ;;  %1582 = vmatprep.mubr.msk.bf16.mxu0 %vm268_vm0, %v663_v63  ;;  %v765_v7 = vpack.c.bf16 %v754_v4, %v751_v3  ;;  %v957_v19 = vrot.slane %v1460_v13, 1  ;;  %v760_v26 = vsel %vm439_vm2, %v758_v6, %v759_v10  ;;  %v1059_v27 = vrot.slane %v1460_v13, 2  ;;  %s231_s17 = scalar_lea.vmem [#allocation3], %s1399_s16  ;;  %s1742_s16 = scalar_lea.vmem %s1741_s10, 1024 }
  0x2d   : > { %1573 = vmatpush3.bf16.msra.mxu1 %v1707_v40  ;;  %v961_v30 = vsel %vm336_vm1, %v1985_v18, %v960_v20  ;;  %v1062_v31 = vrot.slane %v1462_v14, 2  ;;  %v766_v33 = vpack.c.bf16 %v760_v26, %v757_v25  ;;  %v965_v18 = vrot.slane %v1465_v32, 1  ;;  %s1308_s29 = sshll.u32 %s231_s17, 4  ;;  %s2181_s29 = int_to_ptr.vmem [resolvable:$true] %s1308_s29 }
  0x2e   : > { %1586 = vmatprep.subr.bf16.mxu1 %v1710_v0  ;;  %v958_v29 = vsel %vm336_vm1, %v1982_v17, %v957_v19  ;;  %v1060_v35 = vsel %vm439_vm2, %v1993_v21, %v1059_v27  ;;  %v963_v37 = vrot.slane %v1464_v23, 1  ;;  %v966_v38 = vrot.slane %v1466_v24, 1  ;;  %s1736_s8 = scalar_lea.vmem %s2181_s29, 512  ;;  %p1743_p2 = scmp.lt.s32.totalorder %s2181_s29, %s1741_s10 }
  0x2f   : > { %1581 = vmatpush3.bf16.msra.mxu0 %v1709_v56  ;;  %v1063_v17 = vsel %vm439_vm2, %v1996_v22, %v1062_v31  ;;  %v972_v36 = vpack.c.bf16 %v961_v30, %v958_v29  ;;  %v1067_v40 = vrot.slane %v1465_v32, 2  ;;  %v1065_v42 = vrot.slane %v1464_v23, 2  ;;  %v1717_v22 = vld [vmem:[%s2244_s1 + $0x80] sm:$0xff]   ;;  %p1737_p13 = scmp.ne.s32.totalorder %s2181_s29, %s1736_s8  ;;  %p1744_p4 = scmp.lt.s32.totalorder %s1742_s16, %s1736_s8 }
  0x30   : > { %1575 = vmatmul.mubr.msk.bf16.vlgmr.msra.gmra.mxu1 %vm268_vm0, %v554_v5  ;;  %1594 = vmatprep.subr.bf16.mxu0 %v1712_v8  ;;  %v1074_v41 = vpack.c.bf16 %v1063_v17, %v1060_v35  ;;  %v1068_v21 = vrot.slane %v1466_v24, 2  ;;  %v964_v43 = vsel %vm336_vm1, %v656_v53, %v963_v37  ;;  %v967_v44 = vsel %vm336_vm1, %v965_v18, %v966_v38 }
  0x31   : > { %1587 = vmatpush3.bf16.msra.mxu1 %v1710_v0  ;;  %1590 = vmatprep.mubr.msk.bf16.mxu1 %vm268_vm0, %v765_v7  ;;  %v1066_v46 = vsel %vm439_vm2, %v758_v6, %v1065_v42  ;;  %v973_v48 = vpack.c.bf16 %v967_v44, %v964_v43  ;;  %p1738_p0 = pnand %p1737_p13, %p1914_p3  ;;  %p1745_p5 = por %p1744_p4, %p1743_p2 }
  0x32   : > { %1583 = vmatmul.mubr.msk.bf16.vlgmr.msra.gmra.mxu0 %vm268_vm0, %v664_v11  ;;  %1588 = vmatprep.subr.bf16.mxu1 %v1711_v12  ;;  %v1069_v47 = vsel %vm439_vm2, %v1067_v40, %v1068_v21 }
  0x33   : > { %1595 = vmatpush3.bf16.msra.mxu0 %v1712_v8  ;;  %1598 = vmatprep.mubr.msk.bf16.mxu0 %vm268_vm0, %v1979_v16  ;;  %v863_v16 = vpack.c.bf16 %v1465_v32, %v2023_v45  ;;  %v1075_v49 = vpack.c.bf16 %v1069_v47, %v1066_v46  ;;  %v1719_v45 = vld [vmem:[%s2246_s3] sm:$0xff]   ;;  %p1739_p1 = pneg %p1738_p0 }
  0x34   : > { %1596 = vmatprep.subr.bf16.mxu0 %v1713_v15 }
  0x35   : > { %1589 = vmatpush3.bf16.msra.mxu1 %v1711_v12  ;;  %p1746_p6 = pnand %p1745_p5, %p1739_p1 }
  0x36   : > { %1602 = vmatprep.subr.bf16.mxu1 %v1714_v28 }
  0x37   : > { %1597 = vmatpush3.bf16.msra.mxu0 %v1713_v15 }
  0x38   : > { %1591 = vmatmul.mubr.msk.bf16.vlgmr.msra.gmra.mxu1 %vm268_vm0, %v766_v33  ;;  %1610 = vmatprep.subr.bf16.mxu0 %v1716_v34 }
  0x39   : > { %1603 = vmatpush3.bf16.msra.mxu1 %v1714_v28  ;;  %1606 = vmatprep.mubr.msk.bf16.mxu1 %vm268_vm0, %v972_v36 }
  0x3a   : > { %1599 = vmatmul.mubr.msk.bf16.vlgmr.msra.gmra.mxu0 %vm268_vm0, %v863_v16  ;;  %1604 = vmatprep.subr.bf16.mxu1 %v1715_v39 }
  0x3b   : > { %1611 = vmatpush3.bf16.msra.mxu0 %v1716_v34  ;;  %1614 = vmatprep.mubr.msk.bf16.mxu0 %vm268_vm0, %v1074_v41 }
  0x3c   : > { %1612 = vmatprep.subr.bf16.mxu0 %v1717_v22 }
  0x3d   : > { %1605 = vmatpush3.bf16.msra.mxu1 %v1715_v39 }
  0x3e   : > { %1618 = vmatprep.subr.bf16.mxu1 %v1718_v50 }
  0x3f   : > { %1613 = vmatpush3.bf16.msra.mxu0 %v1717_v22 }
  0x40   : > { %1607 = vmatmul.mubr.msk.bf16.vlgmr.msra.gmra.mxu1 %vm268_vm0, %v973_v48 }
  0x41   : > { %1619 = vmatpush3.bf16.msra.mxu1 %v1718_v50 }
  0x42   : > { %1615 = vmatmul.mubr.msk.bf16.vlgmr.msra.gmra.mxu0 %vm268_vm0, %v1075_v49  ;;  %1620 = vmatprep.subr.bf16.mxu1 %v1719_v45 }
  0x45   : > { %1621 = vmatpush3.bf16.msra.mxu1 %v1719_v45 }
  0xe2   : > { %v1552_v51 = vpop.f32.mrf.mxu0 }
  0xe3   : > { %326 = vst.msk [vmem:[#allocation2 + $0x10] sm:$0xff] %vm268_vm0, %v1552_v51 }
  0xe4   : > { %v309_v52 = vpop.f32.mrf.mxu0 }
  0xe5   : > { %324 = vst.msk [vmem:[#allocation2] sm:$0xff] %vm268_vm0, %v309_v52 }
  0xe6   : > { %v1553_v53 = vpop.f32.mrf.mxu0 }
  0xe7   : > { %327 = vst.msk [vmem:[#allocation2 + $0x18] sm:$0xff] %vm268_vm0, %v1553_v53 }
  0xe8   : > { %v1560_v54 = vpop.f32.mrf.mxu1  ;;  %v312_v55 = vpop.f32.mrf.mxu0 }
  0xe9   : > { %325 = vst.msk [vmem:[#allocation2 + $0x8] sm:$0xff] %vm268_vm0, %v312_v55 }
  0xea   : > { %v429_v56 = vld [vmem:[#allocation2 + $0x10] sm:$0xff]  ;;  %v412_v57 = vpop.f32.mrf.mxu1  ;;  %v1568_v63 = vpop.f32.mrf.mxu0 }
  0xeb   : > { %v433_v58 = vadd.f32 %v1560_v54, %v429_v56 }
  0xec   : > { %v427_v59 = vld [vmem:[#allocation2] sm:$0xff]  ;;  %v1561_v60 = vpop.f32.mrf.mxu1  ;;  %v515_v4 = vpop.f32.mrf.mxu0 }
  0xed   : > { %437 = vst.msk [vmem:[#allocation2 + $0x10] sm:$0xff] %vm268_vm0, %v433_v58  ;;  %v431_v61 = vadd.f32 %v427_v59, %v412_v57 }
  0xee   : > { %v430_v62 = vld [vmem:[#allocation2 + $0x18] sm:$0xff]  ;;  %v415_v1 = vpop.f32.mrf.mxu1  ;;  %v1569_v7 = vpop.f32.mrf.mxu0 }
  0xef   : > { %435 = vst.msk [vmem:[#allocation2] sm:$0xff] %vm268_vm0, %v431_v61  ;;  %v434_v0 = vadd.f32 %v1561_v60, %v430_v62 }
  0xf0   : > { %v428_v2 = vld [vmem:[#allocation2 + $0x8] sm:$0xff]  ;;  %v1576_v11 = vpop.f32.mrf.mxu1  ;;  %v518_v13 = vpop.f32.mrf.mxu0 }
  0xf1   : > { %438 = vst.msk [vmem:[#allocation2 + $0x18] sm:$0xff] %vm268_vm0, %v434_v0  ;;  %v432_v3 = vadd.f32 %v428_v2, %v415_v1 }
  0xf2   : > { %v612_v19 = vpop.f32.mrf.mxu1  ;;  %v1584_v28 = vpop.f32.mrf.mxu0 }
  0xf3   : > { %436 = vst.msk [vmem:[#allocation2 + $0x8] sm:$0xff] %vm268_vm0, %v432_v3 }
  0xf4   : > { %v532_v5 = vld [vmem:[#allocation2 + $0x10] sm:$0xff]  ;;  %v1577_v25 = vpop.f32.mrf.mxu1  ;;  %v722_v33 = vpop.f32.mrf.mxu0 }
  0xf5   : > { %v536_v6 = vadd.f32 %v1568_v63, %v532_v5 }
  0xf6   : > { %v530_v8 = vld [vmem:[#allocation2] sm:$0xff]  ;;  %v615_v30 = vpop.f32.mrf.mxu1  ;;  %v1585_v18 = vpop.f32.mrf.mxu0 }
  0xf7   : > { %540 = vst.msk [vmem:[#allocation2 + $0x10] sm:$0xff] %vm268_vm0, %v536_v6  ;;  %v534_v9 = vadd.f32 %v530_v8, %v515_v4 }
  0xf8   : > { %v533_v10 = vld [vmem:[#allocation2 + $0x18] sm:$0xff]  ;;  %v1592_v38 = vpop.f32.mrf.mxu1  ;;  %v725_v39 = vpop.f32.mrf.mxu0 }
  0xf9   : > { %538 = vst.msk [vmem:[#allocation2] sm:$0xff] %vm268_vm0, %v534_v9  ;;  %v537_v12 = vadd.f32 %v1569_v7, %v533_v10 }
  0xfa   : > { %v531_v14 = vld [vmem:[#allocation2 + $0x8] sm:$0xff]  ;;  %v824_v42 = vpop.f32.mrf.mxu1  ;;  %v1600_v48 = vpop.f32.mrf.mxu0 }
  0xfb   : > { %541 = vst.msk [vmem:[#allocation2 + $0x18] sm:$0xff] %vm268_vm0, %v537_v12  ;;  %v535_v15 = vadd.f32 %v531_v14, %v518_v13 }
  0xfc   : > { %v1593_v44 = vpop.f32.mrf.mxu1  ;;  %v921_v52 = vpop.f32.mrf.mxu0 }
  0xfd   : > { %539 = vst.msk [vmem:[#allocation2 + $0x8] sm:$0xff] %vm268_vm0, %v535_v15 }
  0xfe   : > { %v629_v20 = vld [vmem:[#allocation2 + $0x10] sm:$0xff]  ;;  %v827_v50 = vpop.f32.mrf.mxu1  ;;  %v1601_v56 = vpop.f32.mrf.mxu0 }
  0xff   : > { %v633_v23 = vadd.f32 %v1576_v11, %v629_v20 }
 0x100   : > { %v627_v24 = vld [vmem:[#allocation2] sm:$0xff]  ;;  %v1608_v59 = vpop.f32.mrf.mxu1  ;;  %v924_v61 = vpop.f32.mrf.mxu0 }
 0x101   : > { %637 = vst.msk [vmem:[#allocation2 + $0x10] sm:$0xff] %vm268_vm0, %v633_v23  ;;  %v631_v26 = vadd.f32 %v627_v24, %v612_v19 }
 0x102   : > { %v630_v27 = vld [vmem:[#allocation2 + $0x18] sm:$0xff]  ;;  %v1031_v0 = vpop.f32.mrf.mxu1  ;;  %v1616_v8 = vpop.f32.mrf.mxu0 }
 0x103   : > { %635 = vst.msk [vmem:[#allocation2] sm:$0xff] %vm268_vm0, %v631_v26  ;;  %v634_v29 = vadd.f32 %v1577_v25, %v630_v27 }
 0x104   : > { %v628_v31 = vld [vmem:[#allocation2 + $0x8] sm:$0xff]  ;;  %v1609_v4 = vpop.f32.mrf.mxu1  ;;  %v1133_v12 = vpop.f32.mrf.mxu0 }
 0x105   : > { %638 = vst.msk [vmem:[#allocation2 + $0x18] sm:$0xff] %vm268_vm0, %v634_v29  ;;  %v632_v32 = vadd.f32 %v628_v31, %v615_v30  ;;  %v1491_v29 = vld [vmem:[%s2245_s2] ss:$0 sm:$0xff] }
 0x106   : > { %v1034_v9 = vpop.f32.mrf.mxu1  ;;  %v1617_v19 = vpop.f32.mrf.mxu0 }
 0x107   : > { %636 = vst.msk [vmem:[#allocation2 + $0x8] sm:$0xff] %vm268_vm0, %v632_v32 }
 0x108   : > { %v739_v34 = vld [vmem:[#allocation2 + $0x10] sm:$0xff]  ;;  %v1136_v25 = vpop.f32.mrf.mxu0 }
 0x109   : > { %v743_v35 = vadd.f32 %v1584_v28, %v739_v34 }
 0x10a   : > { %v737_v17 = vld [vmem:[#allocation2] sm:$0xff] }
 0x10b   : > { %747 = vst.msk [vmem:[#allocation2 + $0x10] sm:$0xff] %vm268_vm0, %v743_v35  ;;  %v741_v36 = vadd.f32 %v737_v17, %v722_v33 }
 0x10c   : > { %v740_v37 = vld [vmem:[#allocation2 + $0x18] sm:$0xff] }
 0x10d   : > { %745 = vst.msk [vmem:[#allocation2] sm:$0xff] %vm268_vm0, %v741_v36  ;;  %v744_v16 = vadd.f32 %v1585_v18, %v740_v37 }
 0x10e   : > { %v738_v40 = vld [vmem:[#allocation2 + $0x8] sm:$0xff] }
 0x10f   : > { %748 = vst.msk [vmem:[#allocation2 + $0x18] sm:$0xff] %vm268_vm0, %v744_v16  ;;  %v742_v41 = vadd.f32 %v738_v40, %v725_v39  ;;  %v1492_v40 = vld [vmem:[%s2247_s4] ss:$0 sm:$0xff] }
 0x111   : > { %746 = vst.msk [vmem:[#allocation2 + $0x8] sm:$0xff] %vm268_vm0, %v742_v41 }
 0x112   : > { %v841_v21 = vld [vmem:[#allocation2 + $0x10] sm:$0xff] }
 0x113   : > { %v845_v22 = vadd.f32 %v1592_v38, %v841_v21 }
 0x114   : > { %v839_v43 = vld [vmem:[#allocation2] sm:$0xff] }
 0x115   : > { %849 = vst.msk [vmem:[#allocation2 + $0x10] sm:$0xff] %vm268_vm0, %v845_v22  ;;  %v843_v46 = vadd.f32 %v839_v43, %v824_v42 }
 0x116   : > { %v842_v47 = vld [vmem:[#allocation2 + $0x18] sm:$0xff] }
 0x117   : > { %847 = vst.msk [vmem:[#allocation2] sm:$0xff] %vm268_vm0, %v843_v46  ;;  %v846_v49 = vadd.f32 %v1593_v44, %v842_v47 }
 0x118   : > { %v840_v45 = vld [vmem:[#allocation2 + $0x8] sm:$0xff] }
 0x119   : > { %850 = vst.msk [vmem:[#allocation2 + $0x18] sm:$0xff] %vm268_vm0, %v846_v49  ;;  %v844_v51 = vadd.f32 %v840_v45, %v827_v50 }
 0x11b   : > { %848 = vst.msk [vmem:[#allocation2 + $0x8] sm:$0xff] %vm268_vm0, %v844_v51 }
 0x11c   : > { %v938_v53 = vld [vmem:[#allocation2 + $0x10] sm:$0xff] }
 0x11d   : > { %v942_v54 = vadd.f32 %v1600_v48, %v938_v53 }
 0x11e   : > { %v936_v55 = vld [vmem:[#allocation2] sm:$0xff] }
 0x11f   : > { %946 = vst.msk [vmem:[#allocation2 + $0x10] sm:$0xff] %vm268_vm0, %v942_v54  ;;  %v940_v57 = vadd.f32 %v936_v55, %v921_v52 }
 0x120   : > { %v939_v58 = vld [vmem:[#allocation2 + $0x18] sm:$0xff] }
 0x121   : > { %944 = vst.msk [vmem:[#allocation2] sm:$0xff] %vm268_vm0, %v940_v57  ;;  %v943_v60 = vadd.f32 %v1601_v56, %v939_v58  ;;  %v1259_v58 = vlaneseq }
 0x122   : > { %v937_v62 = vld [vmem:[#allocation2 + $0x8] sm:$0xff] }
 0x123   : > { %947 = vst.msk [vmem:[#allocation2 + $0x18] sm:$0xff] %vm268_vm0, %v943_v60  ;;  %v941_v63 = vadd.f32 %v937_v62, %v924_v61 }
 0x125   : > { %945 = vst.msk [vmem:[#allocation2 + $0x8] sm:$0xff] %vm268_vm0, %v941_v63  ;;  %v1260_v63 = vand.u32 127, %v1259_v58 }
 0x126   : > { %v1048_v1 = vld [vmem:[#allocation2 + $0x10] sm:$0xff] }
 0x127   : > { %v1052_v2 = vadd.f32 %v1608_v59, %v1048_v1  ;;  %vm1281_vm3 = vcmp.ge.s32.totalorder %v1260_v63, 54  ;;  %vm1282_vm4 = vcmp.lt.s32.totalorder %v1260_v63, 63 }
 0x128   : > { %v1046_v3 = vld [vmem:[#allocation2] sm:$0xff]  ;;  %vm2173_vm5 = vmand %vm1281_vm3, %vm1282_vm4 }
 0x129   : > { %1056 = vst.msk [vmem:[#allocation2 + $0x10] sm:$0xff] %vm268_vm0, %v1052_v2  ;;  %v1050_v5 = vadd.f32 %v1046_v3, %v1031_v0 }
 0x12a   : > { %v1049_v6 = vld [vmem:[#allocation2 + $0x18] sm:$0xff] }
 0x12b   : > { %1054 = vst.msk [vmem:[#allocation2] sm:$0xff] %vm268_vm0, %v1050_v5  ;;  %v1053_v7 = vadd.f32 %v1609_v4, %v1049_v6 }
 0x12c   : > { %v1047_v10 = vld [vmem:[#allocation2 + $0x8] sm:$0xff] }
 0x12d   : > { %1057 = vst.msk [vmem:[#allocation2 + $0x18] sm:$0xff] %vm268_vm0, %v1053_v7  ;;  %v1051_v11 = vadd.f32 %v1047_v10, %v1034_v9 }
 0x12f   : > { %1055 = vst.msk [vmem:[#allocation2 + $0x8] sm:$0xff] %vm268_vm0, %v1051_v11 }
 0x130   : > { %v1150_v13 = vld [vmem:[#allocation2 + $0x10] sm:$0xff] }
 0x131   : > { %v1154_v14 = vadd.f32 %v1616_v8, %v1150_v13 }
 0x132   : > { %v1148_v15 = vld [vmem:[#allocation2] sm:$0xff] }
 0x133   : > { %1158 = vst.msk [vmem:[#allocation2 + $0x10] sm:$0xff] %vm268_vm0, %v1154_v14  ;;  %v1152_v20 = vadd.f32 %v1148_v15, %v1133_v12 }
 0x134   : > { %v1151_v23 = vld [vmem:[#allocation2 + $0x18] sm:$0xff] }
 0x135   : > { %1156 = vst.msk [vmem:[#allocation2] sm:$0xff] %vm268_vm0, %v1152_v20  ;;  %v1155_v24 = vadd.f32 %v1617_v19, %v1151_v23 }
 0x136   : > { %v1149_v26 = vld [vmem:[#allocation2 + $0x8] sm:$0xff] }
 0x137   : > { %1159 = vst.msk [vmem:[#allocation2 + $0x18] sm:$0xff] %vm268_vm0, %v1155_v24  ;;  %v1153_v27 = vadd.f32 %v1149_v26, %v1136_v25 }
 0x139   : > { %1157 = vst.msk [vmem:[#allocation2 + $0x8] sm:$0xff] %vm268_vm0, %v1153_v27 }
 0x13a   : > { %v1162_v30 = vld [vmem:[#allocation2 + $0x10] sm:$0xff] }
 0x13b   : > { %v1173_v35 = vadd.f32 %v1491_v29, %v1162_v30 }
 0x13c   : > { %v1160_v28 = vld [vmem:[#allocation2] sm:$0xff] }
 0x13d   : > { %v1171_v32 = vadd.f32 %v1491_v29, %v1160_v28  ;;  %v1177_v38 = vmax.f32 %v1173_v35, 0.0 }
 0x13e   : > { %v1163_v31 = vld [vmem:[#allocation2 + $0x18] sm:$0xff] }
 0x13f   : > { %v1174_v33 = vadd.f32 %v1491_v29, %v1163_v31  ;;  %v1175_v36 = vmax.f32 %v1171_v32, 0.0 }
 0x140   : > { %v1161_v34 = vld [vmem:[#allocation2 + $0x8] sm:$0xff] }
 0x141   : > { %v1172_v17 = vadd.f32 %v1491_v29, %v1161_v34  ;;  %v1178_v18 = vmax.f32 %v1174_v33, 0.0 }
 0x143   : > { %v1176_v37 = vmax.f32 %v1172_v17, 0.0  ;;  %v1180_v39 = vpack.c.bf16 %v1178_v18, %v1177_v38 }
 0x145   : > { %v1179_v16 = vpack.c.bf16 %v1176_v37, %v1175_v36 }
 0x147   : > { %1622 = vmatprep.mubr.msk.bf16.mxu1 %vm268_vm0, %v1179_v16 }
 0x148   : > { %1623 = vmatmul.mubr.msk.bf16.vlgmr.msra.gmra.mxu1 %vm268_vm0, %v1180_v39 }
 0x208   : > { %v1624_v41 = vpop.f32.mrf.mxu1 }
 0x209   : > { %v1253_v42 = vadd.f32 %v1624_v41, %v1492_v40 }
 0x20a   : > { %v1244_v21 = vpop.f32.mrf.mxu1 }
 0x20b   : > { %v1263_v22 = vsub.f32 0.0, %v1253_v42  ;;  %v1245_v43 = vadd.f32 %v1492_v40, %v1244_v21 }
 0x20c   : > { %v1625_v44 = vpop.f32.mrf.mxu1 }
 0x20d   : > { %v1269_v46 = vmul.f32 1.442695, %v1263_v22  ;;  %v1261_v47 = vsub.f32 0.0, %v1245_v43  ;;  %v1256_v48 = vadd.f32 %v1625_v44, %v1492_v40 }
 0x20e   : > { %v1247_v49 = vpop.f32.mrf.mxu1 }
 0x20f   : > { %1720 = vpow2.f32 %v1269_v46  ;;  %v1265_v50 = vmul.f32 1.442695, %v1261_v47  ;;  %v1264_v45 = vsub.f32 0.0, %v1256_v48  ;;  %v1248_v51 = vadd.f32 %v1492_v40, %v1247_v49 }
 0x211   : > { %1722 = vpow2.f32 %v1265_v50  ;;  %v1271_v52 = vmul.f32 1.442695, %v1264_v45  ;;  %v1262_v53 = vsub.f32 0.0, %v1248_v51 }
 0x213   : > { %1724 = vpow2.f32 %v1271_v52  ;;  %v1267_v54 = vmul.f32 1.442695, %v1262_v53 }
 0x215   : > { %1726 = vpow2.f32 %v1267_v54 }
 0x21c   : > { %v1721_v55 = vpop.eup %1720 }
 0x21d   : > { %v1275_v56 = vadd.f32 1.0, %v1721_v55 }
 0x21e   : > { %v1723_v57 = vpop.eup %1722 }
 0x21f   : > { %1728 = vrcp.f32 %v1275_v56  ;;  %v1273_v59 = vadd.f32 1.0, %v1723_v57 }
 0x220   : > { %v1725_v60 = vpop.eup %1724 }
 0x221   : > { %1730 = vrcp.f32 %v1273_v59  ;;  %v1276_v61 = vadd.f32 1.0, %v1725_v60 }
 0x222   : > { %v1727_v62 = vpop.eup %1726 }
 0x223   : > { %1732 = vrcp.f32 %v1276_v61  ;;  %v1274_v0 = vadd.f32 1.0, %v1727_v62 }
 0x225   : > { %1734 = vrcp.f32 %v1274_v0 }
 0x22c   : > { %v1729_v2 = vpop.eup %1728 }
 0x22d   : > { %v1286_v3 = vsel %vm2173_vm5, %v1729_v2, %v1253_v42 }
 0x22e   : > { %v1731_v4 = vpop.eup %1730  ;;  %1290 = vst [vmem:[%s231_s17 + $0x10] sm:$0xff] %v1286_v3 }
 0x22f   : > { %v1284_v5 = vsel %vm2173_vm5, %v1731_v4, %v1245_v43 }
 0x230   : > { %v1733_v6 = vpop.eup %1732  ;;  %1288 = vst [vmem:[%s231_s17] sm:$0xff] %v1284_v5 }
 0x231   : > { %v1287_v8 = vsel %vm2173_vm5, %v1733_v6, %v1256_v48 }
 0x232   : > { %v1735_v7 = vpop.eup %1734  ;;  %1291 = vst [vmem:[%s231_s17 + $0x18] sm:$0xff] %v1287_v8 }
 0x233   : > { %v1285_v9 = vsel %vm2173_vm5, %v1735_v7, %v1248_v51 }
 0x234   : > { %1289 = vst [vmem:[%s231_s17 + $0x8] sm:$0xff] %v1285_v9 }
 0x235   : > { %1749 = shalt.err (!%p1746_p6)
}
 0x236   : > { %s1750_s12 = scalar_lea.hbm %s2188_s27, 512  ;;  %s1754_s15 = scalar_lea.hbm %s2248_s5, 2048 }
 0x237   : > { %p1751_p7 = scmp.ne.s32.totalorder %s2188_s27, %s1750_s12  ;;  %p1755_p11 = scmp.lt.s32.totalorder %s2188_s27, %s2248_s5 }
 0x238   : > { %p1756_p12 = scmp.lt.s32.totalorder %s1754_s15, %s1750_s12 }
 0x239   : > { %p1752_p9 = pnand %p1751_p7, %p1914_p3 }
 0x23a   : > { %p1757_p13 = por %p1756_p12, %p1755_p11 }
 0x23b   : > { %p1753_p10 = pneg %p1752_p9 }
 0x23d   : > { %p1758_p0 = pnand %p1757_p13, %p1753_p10 }
 0x23f   : > { %1761 = shalt.err (!%p1758_p0)
}
 0x240   : > { %s1831_s21 = smov 128   ;;  %s1832_s22 = smov 8  }
 0x241   : > { %1627 = dma.vmem_to_hbm [thread:$0]  (%p1914_p3), %s2181_s29, 512, %s2188_s27, %s2192_s30, %s1831_s21, %s1831_s21, %s1832_s22  }
 0x242 PF: > { %p1633_p1 = scmp.ge.s32.totalorder %s1828_s25, 2  ;;  %s1323_s8 = sand.u32 1, %s1800_s18  }
 0x243   : > { %s1324_s9 = scalar_lea.sflag [#allocation4], %s1323_s8 }
 0x244   : > { %p1630_p2 = pnand %p1633_p1, %p1923_p8 }
 0x246   : > { %p1631_p4 = pneg %p1630_p2 }
 0x248   : > { %1795 = dma.done.wait (%p1631_p4), %s1324_s9, 512  }
 0x249   : > { %1797 = vsyncadd (%p1631_p4), %s1324_s9, 4294966784  ;;  %s18_s25 = sadd.s32 1, %s1828_s25   ;;  %s2255_s6 = sld [smem:[#allocation6_spill]] }
 0x24a   : > { %p15_p5 = scmp.ge.s32.totalorder %s18_s25, 6   ;;  %s2256_s18 = smov %s1804_s19 }
 0x24b   : > { %s2257_s19 = smov %s1808_s20  ;;  %s2258_s20 = smov %s1932_s11 }
 0x24c   : > { %s2259_s21 = smov %s1820_s23  ;;  %s2260_s22 = smov %s1824_s24 }
 0x24d   : > { %s2261_s23 = smov %s2264_s28  ;;  %17 = sbr.rel (!%p15_p5) target bundleno = 5 (0x5), region = 86 }
 0x24f   : > { %s2262_s24 = smov %s2255_s6 }
 0x252   :  { %1329 = vsyncpa [#allocation4], 1 }
 0x253   :  { %1331 = vsyncpa [#allocation4 + $0x1], 1 }

</bundles_post_ra>
